<compile_context>
chip_gen: v7x
topology: tpu7x:2x2x1
jax: 0.10.0
libtpu: 0.0.40
codegen_flags: <defaults>
</compile_context>

<pallas_src>
from functools import partial

import jax
import jax.numpy as jnp
from jax.experimental import pallas as pl
from jax.experimental.pallas import tpu as pltpu

HIDDEN = 64  # lstm_out in LSTMNet
BB = 8       # per-grid-point batch tile (one f32 sublane tile)


def _lstm_predict_kernel(obs_ref, act_ref, wobs_ref, wact_ref, whh_ref, b_ref,
                         wpost_ref, bpost_ref, out_ref, gates_sc, h_all_sc,
                         *, T, H, HW, A):
    TB = T * BB

    # ---- Phase 0: input projection for all T steps in one MXU pass --------
    # one-hot(action) built in-kernel; its contribution is a tiny K=A matmul.
    onehot = (jax.lax.broadcasted_iota(jnp.int32, (TB, A), 1)
              == act_ref[...]).astype(jnp.bfloat16)
    gates_sc[...] = (
        jnp.dot(obs_ref[...], wobs_ref[...], preferred_element_type=jnp.float32)
        + jnp.dot(onehot, wact_ref[...], preferred_element_type=jnp.float32)
        + b_ref[...])

    whh = whh_ref[...]  # bf16 (H, 4H): 8 vregs hoisted across the unrolled loop

    # ---- Phase 1: the serial recurrence (h, c carried in vregs) -----------
    def step(t, carry):
        h, c = carry
        row = pl.multiple_of(t * BB, BB)              # sublane-aligned slice
        gates = gates_sc[pl.ds(row, BB), :] + jnp.dot(
            h.astype(jnp.bfloat16), whh, preferred_element_type=jnp.float32)
        sig = jax.nn.sigmoid(gates)                   # ONE EUP pass over 4H lanes
        i_g = sig[:, 0 * H:1 * H]
        f_g = sig[:, 1 * H:2 * H]
        g_g = 2.0 * sig[:, 2 * H:3 * H] - 1.0         # tanh via pre-scaled sigmoid
        o_g = sig[:, 3 * H:4 * H]
        c = f_g * c + i_g * g_g
        h = o_g * jnp.tanh(c)
        h_all_sc[pl.ds(row, BB), :] = h
        return h, c

    h0 = jnp.zeros((BB, H), jnp.float32)
    c0 = jnp.zeros((BB, H), jnp.float32)
    jax.lax.fori_loop(0, T, step, (h0, c0), unroll=True)

    # ---- Phase 2: post layer + softplus + heat-map normalize, one slab ----
    post = (jnp.dot(h_all_sc[...].astype(jnp.bfloat16), wpost_ref[...],
                    preferred_element_type=jnp.float32) + bpost_ref[...])
    out = jax.nn.softplus(post) + 0.1                 # LSTMNet.bias
    lane = jax.lax.broadcasted_iota(jnp.int32, out.shape, 1)
    denom = jnp.sum(jnp.where(lane < HW, out, 0.0), axis=-1, keepdims=True)
    out_ref[...] = out / denom                        # exact normalization


def lstm_predict_forward(obs, action, params, map_shape, action_dim):
    """obs: (B, T, F) f32, action: (B, T, 1) int32 -> (B, T, *map_shape) f32."""
    B, T, F = obs.shape
    A = action_dim
    H = HIDDEN
    HW = map_shape[0] * map_shape[1]
    G = max(1, pl.cdiv(B, BB))                  # batch chunks -> grid (v7x: 2 TCs)
    B_pad = G * BB
    HW_pad = pl.cdiv(HW, 128) * 128             # lane-dense output slab
    TB = T * BB

    # Layout: (B, T, last) -> (G, T, BB, last) -> (G*T*BB, last);
    # row within a chunk = t*BB + b_local (t-major so per-step slices are tiles).
    def to_blocks(arr):
        last = arr.shape[-1]
        a = jnp.transpose(arr, (1, 0, 2))                    # (T, B, last)
        a = jnp.pad(a, ((0, 0), (0, B_pad - B), (0, 0)))     # (T, Bp, last)
        a = a.reshape(T, G, BB, last)
        a = jnp.transpose(a, (1, 0, 2, 3))                   # (G, T, BB, last)
        return a.reshape(G * TB, last)

    obs2 = to_blocks(obs.astype(jnp.bfloat16))               # (G*TB, F) bf16
    act2 = to_blocks(action.astype(jnp.int32))               # (G*TB, 1) int32

    # tanh -> sigmoid identity: pre-scale the g-gate rows by 2.
    scale = jnp.concatenate([jnp.ones((2 * H,), jnp.float32),
                             jnp.full((H,), 2.0, jnp.float32),
                             jnp.ones((H,), jnp.float32)])
    w_ih = params["w_ih"] * scale[:, None]                   # (4H, F+A)
    w_hh = params["w_hh"] * scale[:, None]                   # (4H, H)
    b = ((params["b_ih"] + params["b_hh"]) * scale).reshape(1, 4 * H)

    wobs_t = w_ih[:, :F].T.astype(jnp.bfloat16)              # (F, 4H)
    wact_t = w_ih[:, F:F + A].T.astype(jnp.bfloat16)         # (A, 4H)
    whh_t = w_hh.T.astype(jnp.bfloat16)                      # (H, 4H)
    wpost_t = jnp.pad(params["w_post"].T,
                      ((0, 0), (0, HW_pad - HW))).astype(jnp.bfloat16)
    bpost = jnp.pad(params["b_post"].reshape(1, HW), ((0, 0), (0, HW_pad - HW)))

    kernel = partial(_lstm_predict_kernel, T=T, H=H, HW=HW, A=A)

    out = pl.pallas_call(
        kernel,
        out_shape=jax.ShapeDtypeStruct((G * TB, HW_pad), jnp.float32),
        grid_spec=pltpu.PrefetchScalarGridSpec(
            num_scalar_prefetch=0,
            grid=(G,),  # independent 8-row recurrences; parallel across cores
            in_specs=[
                pl.BlockSpec((TB, F), lambda g: (g, 0)),          # obs
                pl.BlockSpec((TB, 1), lambda g: (g, 0)),          # action idx
                pl.BlockSpec((F, 4 * H), lambda g: (0, 0)),       # W_ih (obs)
                pl.BlockSpec((A, 4 * H), lambda g: (0, 0)),       # W_ih (action)
                pl.BlockSpec((H, 4 * H), lambda g: (0, 0)),       # W_hh
                pl.BlockSpec((1, 4 * H), lambda g: (0, 0)),       # bias
                pl.BlockSpec((H, HW_pad), lambda g: (0, 0)),      # W_post
                pl.BlockSpec((1, HW_pad), lambda g: (0, 0)),      # b_post
            ],
            out_specs=pl.BlockSpec((TB, HW_pad), lambda g: (g, 0)),
            scratch_shapes=[
                pltpu.VMEM((TB, 4 * H), jnp.float32),  # gates_x for all T steps
                pltpu.VMEM((TB, H), jnp.float32),      # all per-step h
            ],
        ),
        compiler_params=pltpu.CompilerParams(
            dimension_semantics=("parallel",)),
    )(obs2, act2, wobs_t, wact_t, whh_t, b, wpost_t, bpost)

    out = out.reshape(G, T, BB, HW_pad)
    out = jnp.transpose(out, (1, 0, 2, 3)).reshape(T, B_pad, HW_pad)
    out = out[:, :B, :HW]                                    # drop pads
    out = jnp.transpose(out, (1, 0, 2)).reshape(B, T, *map_shape)
    return out


def _reference_forward(obs, action, params, map_shape, action_dim):
    """Pure-JAX reference of the PyTorch forward (for correctness check)."""
    B, T, F = obs.shape
    one_hot = jnp.eye(action_dim, dtype=obs.dtype)[action[..., 0]]
    x = jnp.concatenate([obs, one_hot], axis=-1)  # (B, T, D_in)

    def step(carry, xt):
        h, c = carry
        gates = (xt @ params["w_ih"].T + params["b_ih"]
                 + h @ params["w_hh"].T + params["b_hh"])
        i, f, g, o = jnp.split(gates, 4, axis=-1)
        c = jax.nn.sigmoid(f) * c + jax.nn.sigmoid(i) * jnp.tanh(g)
        h = jax.nn.sigmoid(o) * jnp.tanh(c)
        out = jax.nn.softplus(h @ params["w_post"].T + params["b_post"]) + 0.1
        out = out / jnp.sum(out, axis=-1, keepdims=True)
        return (h, c), out

    h0 = jnp.zeros((B, HIDDEN), jnp.float32)
    c0 = jnp.zeros((B, HIDDEN), jnp.float32)
    _, outs = jax.lax.scan(step, (h0, c0), jnp.transpose(x, (1, 0, 2)))
    return jnp.transpose(outs, (1, 0, 2)).reshape(B, T, *map_shape)


def _init_params(key, d_in, hidden, hw):
    # Deterministic, PyTorch-style uniform(-1/sqrt(H), 1/sqrt(H)) init.
    ks = jax.random.split(key, 6)
    k_lstm = 1.0 / jnp.sqrt(hidden)
    k_post = 1.0 / jnp.sqrt(hidden)
    return {
        "w_ih": jax.random.uniform(ks[0], (4 * hidden, d_in), jnp.float32,
                                   -k_lstm, k_lstm),
        "w_hh": jax.random.uniform(ks[1], (4 * hidden, hidden), jnp.float32,
                                   -k_lstm, k_lstm),
        "b_ih": jax.random.uniform(ks[2], (4 * hidden,), jnp.float32,
                                   -k_lstm, k_lstm),
        "b_hh": jax.random.uniform(ks[3], (4 * hidden,), jnp.float32,
                                   -k_lstm, k_lstm),
        "w_post": jax.random.uniform(ks[4], (hw, hidden), jnp.float32,
                                     -k_post, k_post),
        "b_post": jax.random.uniform(ks[5], (hw,), jnp.float32,
                                     -k_post, k_post),
    }


if __name__ == "__main__":
    # Small shapes consistent with the module:
    # feature_dim=12, 4 directions (action_dim=4), predict_map_shape=(8, 8)
    B, T, FEAT = 2, 8, 12
    ACTION_DIM = 4
    MAP_SHAPE = (8, 8)
    D_IN = FEAT + ACTION_DIM
    HW = MAP_SHAPE[0] * MAP_SHAPE[1]

    root = jax.random.PRNGKey(0)
    k_obs, k_act, k_par = jax.random.split(root, 3)
    obs = jax.random.normal(k_obs, (B, T, FEAT), jnp.float32)
    action = jax.random.randint(k_act, (B, T, 1), 0, ACTION_DIM, jnp.int32)
    params = _init_params(k_par, D_IN, HIDDEN, HW)

    fwd = jax.jit(partial(lstm_predict_forward, map_shape=MAP_SHAPE,
                          action_dim=ACTION_DIM))
    out = fwd(obs, action, params)
    out = jax.block_until_ready(out)

    ref = _reference_forward(obs, action, params, MAP_SHAPE, ACTION_DIM)
    ref = jax.block_until_ready(ref)

    assert out.shape == (B, T, *MAP_SHAPE), out.shape
    # Tolerance accounts for bf16 MXU operands feeding back through the h
    # recurrence (same rounding the previous default-precision version had).
    assert jnp.allclose(out, ref, atol=3e-4, rtol=3e-3), (
        float(jnp.max(jnp.abs(out - ref))))
    print("KERNEL_OK")
</pallas_src>

<mosaic_0001>
module attributes {stable_mosaic.version = 11 : i64} {
  func.func @_lstm_predict_kernel(%arg0: i32, %arg1: memref<64x12xbf16, #tpu.memory_space<vmem>>, %arg2: memref<64x1xi32, #tpu.memory_space<vmem>>, %arg3: memref<12x256xbf16, #tpu.memory_space<vmem>>, %arg4: memref<4x256xbf16, #tpu.memory_space<vmem>>, %arg5: memref<64x256xbf16, #tpu.memory_space<vmem>>, %arg6: memref<1x256xf32, #tpu.memory_space<vmem>>, %arg7: memref<64x128xbf16, #tpu.memory_space<vmem>>, %arg8: memref<1x128xf32, #tpu.memory_space<vmem>>, %arg9: memref<64x128xf32, #tpu.memory_space<vmem>>, %arg10: memref<64x256xf32, #tpu.memory_space<vmem>>, %arg11: memref<64x64xf32, #tpu.memory_space<vmem>>) attributes {dimension_semantics = [#tpu.dimension_semantics<parallel>], iteration_bounds = array<i64: 1>, scalar_prefetch = 0 : i64, scratch_operands = 2 : i64, tpu.core_type = #tpu.core_type<tc>, window_params = [{transform_indices = @transform_0, window_bounds = array<i64: 64, 12>}, {transform_indices = @transform_1, window_bounds = array<i64: 64, 1>}, {pipeline_mode = #tpu.pipeline_mode<synchronous>, transform_indices = @transform_2, window_bounds = array<i64: 12, 256>}, {pipeline_mode = #tpu.pipeline_mode<synchronous>, transform_indices = @transform_3, window_bounds = array<i64: 4, 256>}, {pipeline_mode = #tpu.pipeline_mode<synchronous>, transform_indices = @transform_4, window_bounds = array<i64: 64, 256>}, {pipeline_mode = #tpu.pipeline_mode<synchronous>, transform_indices = @transform_5, window_bounds = array<i64: 1, 256>}, {pipeline_mode = #tpu.pipeline_mode<synchronous>, transform_indices = @transform_6, window_bounds = array<i64: 64, 128>}, {pipeline_mode = #tpu.pipeline_mode<synchronous>, transform_indices = @transform_7, window_bounds = array<i64: 1, 128>}, {transform_indices = @transform_8, window_bounds = array<i64: 64, 128>}]} {
    %0 = tpu.iota {dimensions = array<i32: 1>} : vector<64x4xi32>
    %c0 = arith.constant 0 : index
    %c0_0 = arith.constant 0 : index
    %1 = vector.load %arg2[%c0, %c0_0] : memref<64x1xi32, #tpu.memory_space<vmem>>, vector<64x1xi32>
    %2 = vector.broadcast %1 : vector<64x1xi32> to vector<64x4xi32>
    %3 = arith.cmpi eq, %0, %2 : vector<64x4xi32>
    %4 = arith.extui %3 : vector<64x4xi1> to vector<64x4xi32>
    %5 = arith.sitofp %4 : vector<64x4xi32> to vector<64x4xf32>
    %6 = arith.truncf %5 : vector<64x4xf32> to vector<64x4xbf16>
    %c0_1 = arith.constant 0 : index
    %c0_2 = arith.constant 0 : index
    %7 = vector.load %arg1[%c0_1, %c0_2] : memref<64x12xbf16, #tpu.memory_space<vmem>>, vector<64x12xbf16>
    %c0_3 = arith.constant 0 : index
    %c0_4 = arith.constant 0 : index
    %8 = vector.load %arg3[%c0_3, %c0_4] : memref<12x256xbf16, #tpu.memory_space<vmem>>, vector<12x256xbf16>
    %cst = arith.constant dense<0.000000e+00> : vector<64x256xf32>
    %9 = tpu.matmul %7, %8, %cst {dimension_numbers = #tpu.dot_dimension_numbers<[1], [0], [0], [1], [0, 0, 1, 1], [], []>} : vector<64x12xbf16>, vector<12x256xbf16>, vector<64x256xf32> -> vector<64x256xf32>
    %c0_5 = arith.constant 0 : index
    %c0_6 = arith.constant 0 : index
    %10 = vector.load %arg4[%c0_5, %c0_6] : memref<4x256xbf16, #tpu.memory_space<vmem>>, vector<4x256xbf16>
    %cst_7 = arith.constant dense<0.000000e+00> : vector<64x256xf32>
    %11 = tpu.matmul %6, %10, %cst_7 {dimension_numbers = #tpu.dot_dimension_numbers<[1], [0], [0], [1], [0, 0, 1, 1], [], []>} : vector<64x4xbf16>, vector<4x256xbf16>, vector<64x256xf32> -> vector<64x256xf32>
    %12 = arith.addf %9, %11 : vector<64x256xf32>
    %c0_8 = arith.constant 0 : index
    %c0_9 = arith.constant 0 : index
    %13 = vector.load %arg6[%c0_8, %c0_9] : memref<1x256xf32, #tpu.memory_space<vmem>>, vector<1x256xf32>
    %14 = vector.broadcast %13 : vector<1x256xf32> to vector<64x256xf32>
    %15 = arith.addf %12, %14 : vector<64x256xf32>
    %c0_10 = arith.constant 0 : index
    %c0_11 = arith.constant 0 : index
    %16 = vector.load %arg10[%c0_10, %c0_11] : memref<64x256xf32, #tpu.memory_space<vmem>>, vector<64x256xf32>
    tpu.vector_store %arg10[%c0_10, %c0_11], %15 {strides = array<i32>} : memref<64x256xf32, #tpu.memory_space<vmem>>, vector<64x256xf32>,
    %c0_12 = arith.constant 0 : index
    %c0_13 = arith.constant 0 : index
    %17 = vector.load %arg5[%c0_12, %c0_13] : memref<64x256xbf16, #tpu.memory_space<vmem>>, vector<64x256xbf16>
    %cst_14 = arith.constant 0.000000e+00 : f32
    %18 = vector.broadcast %cst_14 : f32 to vector<8x64xf32>
    %cst_15 = arith.constant 0.000000e+00 : f32
    %19 = vector.broadcast %cst_15 : f32 to vector<8x64xf32>
    %c0_i32 = arith.constant 0 : i32
    %c8_i32 = arith.constant 8 : i32
    %20 = arith.muli %c0_i32, %c8_i32 : i32
    %21 = tpu.assume_multiple %20, 8 : i32
    %22 = arith.index_cast %21 : i32 to index
    %c0_16 = arith.constant 0 : index
    %23 = vector.load %arg10[%22, %c0_16] : memref<64x256xf32, #tpu.memory_space<vmem>>, vector<8x256xf32>
    %24 = arith.truncf %18 : vector<8x64xf32> to vector<8x64xbf16>
    %cst_17 = arith.constant dense<0.000000e+00> : vector<8x256xf32>
    %25 = tpu.matmul %24, %17, %cst_17 {dimension_numbers = #tpu.dot_dimension_numbers<[1], [0], [0], [1], [0, 0, 1, 1], [], []>} : vector<8x64xbf16>, vector<64x256xbf16>, vector<8x256xf32> -> vector<8x256xf32>
    %26 = arith.addf %23, %25 : vector<8x256xf32>
    %27 = arith.negf %26 : vector<8x256xf32>
    %28 = math.exp %27 : vector<8x256xf32>
    %cst_18 = arith.constant 1.000000e+00 : f32
    %29 = vector.broadcast %cst_18 : f32 to vector<8x256xf32>
    %30 = arith.addf %29, %28 : vector<8x256xf32>
    %31 = arith.divf %29, %30 : vector<8x256xf32>
    %32 = vector.extract_strided_slice %31 {offsets = [0, 0], sizes = [8, 64], strides = [1, 1]} : vector<8x256xf32> to vector<8x64xf32>
    %33 = vector.extract_strided_slice %31 {offsets = [0, 64], sizes = [8, 64], strides = [1, 1]} : vector<8x256xf32> to vector<8x64xf32>
    %34 = vector.extract_strided_slice %31 {offsets = [0, 128], sizes = [8, 64], strides = [1, 1]} : vector<8x256xf32> to vector<8x64xf32>
    %cst_19 = arith.constant 2.000000e+00 : f32
    %35 = vector.broadcast %cst_19 : f32 to vector<8x64xf32>
    %36 = arith.mulf %35, %34 : vector<8x64xf32>
    %cst_20 = arith.constant 1.000000e+00 : f32
    %37 = vector.broadcast %cst_20 : f32 to vector<8x64xf32>
    %38 = arith.subf %36, %37 : vector<8x64xf32>
    %39 = vector.extract_strided_slice %31 {offsets = [0, 192], sizes = [8, 64], strides = [1, 1]} : vector<8x256xf32> to vector<8x64xf32>
    %40 = arith.mulf %33, %19 : vector<8x64xf32>
    %41 = arith.mulf %32, %38 : vector<8x64xf32>
    %42 = arith.addf %40, %41 : vector<8x64xf32>
    %43 = math.tanh %42 : vector<8x64xf32>
    %44 = arith.mulf %39, %43 : vector<8x64xf32>
    %45 = arith.index_cast %21 : i32 to index
    %c0_21 = arith.constant 0 : index
    %46 = vector.load %arg11[%45, %c0_21] : memref<64x64xf32, #tpu.memory_space<vmem>>, vector<8x64xf32>
    tpu.vector_store %arg11[%45, %c0_21], %44 {strides = array<i32>} : memref<64x64xf32, #tpu.memory_space<vmem>>, vector<8x64xf32>,
    %c1_i32 = arith.constant 1 : i32
    %c8_i32_22 = arith.constant 8 : i32
    %47 = arith.muli %c1_i32, %c8_i32_22 : i32
    %48 = tpu.assume_multiple %47, 8 : i32
    %49 = arith.index_cast %48 : i32 to index
    %c0_23 = arith.constant 0 : index
    %50 = vector.load %arg10[%49, %c0_23] : memref<64x256xf32, #tpu.memory_space<vmem>>, vector<8x256xf32>
    %51 = arith.truncf %44 : vector<8x64xf32> to vector<8x64xbf16>
    %cst_24 = arith.constant dense<0.000000e+00> : vector<8x256xf32>
    %52 = tpu.matmul %51, %17, %cst_24 {dimension_numbers = #tpu.dot_dimension_numbers<[1], [0], [0], [1], [0, 0, 1, 1], [], []>} : vector<8x64xbf16>, vector<64x256xbf16>, vector<8x256xf32> -> vector<8x256xf32>
    %53 = arith.addf %50, %52 : vector<8x256xf32>
    %54 = arith.negf %53 : vector<8x256xf32>
    %55 = math.exp %54 : vector<8x256xf32>
    %cst_25 = arith.constant 1.000000e+00 : f32
    %56 = vector.broadcast %cst_25 : f32 to vector<8x256xf32>
    %57 = arith.addf %56, %55 : vector<8x256xf32>
    %58 = arith.divf %56, %57 : vector<8x256xf32>
    %59 = vector.extract_strided_slice %58 {offsets = [0, 0], sizes = [8, 64], strides = [1, 1]} : vector<8x256xf32> to vector<8x64xf32>
    %60 = vector.extract_strided_slice %58 {offsets = [0, 64], sizes = [8, 64], strides = [1, 1]} : vector<8x256xf32> to vector<8x64xf32>
    %61 = vector.extract_strided_slice %58 {offsets = [0, 128], sizes = [8, 64], strides = [1, 1]} : vector<8x256xf32> to vector<8x64xf32>
    %cst_26 = arith.constant 2.000000e+00 : f32
    %62 = vector.broadcast %cst_26 : f32 to vector<8x64xf32>
    %63 = arith.mulf %62, %61 : vector<8x64xf32>
    %cst_27 = arith.constant 1.000000e+00 : f32
    %64 = vector.broadcast %cst_27 : f32 to vector<8x64xf32>
    %65 = arith.subf %63, %64 : vector<8x64xf32>
    %66 = vector.extract_strided_slice %58 {offsets = [0, 192], sizes = [8, 64], strides = [1, 1]} : vector<8x256xf32> to vector<8x64xf32>
    %67 = arith.mulf %60, %42 : vector<8x64xf32>
    %68 = arith.mulf %59, %65 : vector<8x64xf32>
    %69 = arith.addf %67, %68 : vector<8x64xf32>
    %70 = math.tanh %69 : vector<8x64xf32>
    %71 = arith.mulf %66, %70 : vector<8x64xf32>
    %72 = arith.index_cast %48 : i32 to index
    %c0_28 = arith.constant 0 : index
    %73 = vector.load %arg11[%72, %c0_28] : memref<64x64xf32, #tpu.memory_space<vmem>>, vector<8x64xf32>
    tpu.vector_store %arg11[%72, %c0_28], %71 {strides = array<i32>} : memref<64x64xf32, #tpu.memory_space<vmem>>, vector<8x64xf32>,
    %c2_i32 = arith.constant 2 : i32
    %c8_i32_29 = arith.constant 8 : i32
    %74 = arith.muli %c2_i32, %c8_i32_29 : i32
    %75 = tpu.assume_multiple %74, 8 : i32
    %76 = arith.index_cast %75 : i32 to index
    %c0_30 = arith.constant 0 : index
    %77 = vector.load %arg10[%76, %c0_30] : memref<64x256xf32, #tpu.memory_space<vmem>>, vector<8x256xf32>
    %78 = arith.truncf %71 : vector<8x64xf32> to vector<8x64xbf16>
    %cst_31 = arith.constant dense<0.000000e+00> : vector<8x256xf32>
    %79 = tpu.matmul %78, %17, %cst_31 {dimension_numbers = #tpu.dot_dimension_numbers<[1], [0], [0], [1], [0, 0, 1, 1], [], []>} : vector<8x64xbf16>, vector<64x256xbf16>, vector<8x256xf32> -> vector<8x256xf32>
    %80 = arith.addf %77, %79 : vector<8x256xf32>
    %81 = arith.negf %80 : vector<8x256xf32>
    %82 = math.exp %81 : vector<8x256xf32>
    %cst_32 = arith.constant 1.000000e+00 : f32
    %83 = vector.broadcast %cst_32 : f32 to vector<8x256xf32>
    %84 = arith.addf %83, %82 : vector<8x256xf32>
    %85 = arith.divf %83, %84 : vector<8x256xf32>
    %86 = vector.extract_strided_slice %85 {offsets = [0, 0], sizes = [8, 64], strides = [1, 1]} : vector<8x256xf32> to vector<8x64xf32>
    %87 = vector.extract_strided_slice %85 {offsets = [0, 64], sizes = [8, 64], strides = [1, 1]} : vector<8x256xf32> to vector<8x64xf32>
    %88 = vector.extract_strided_slice %85 {offsets = [0, 128], sizes = [8, 64], strides = [1, 1]} : vector<8x256xf32> to vector<8x64xf32>
    %cst_33 = arith.constant 2.000000e+00 : f32
    %89 = vector.broadcast %cst_33 : f32 to vector<8x64xf32>
    %90 = arith.mulf %89, %88 : vector<8x64xf32>
    %cst_34 = arith.constant 1.000000e+00 : f32
    %91 = vector.broadcast %cst_34 : f32 to vector<8x64xf32>
    %92 = arith.subf %90, %91 : vector<8x64xf32>
    %93 = vector.extract_strided_slice %85 {offsets = [0, 192], sizes = [8, 64], strides = [1, 1]} : vector<8x256xf32> to vector<8x64xf32>
    %94 = arith.mulf %87, %69 : vector<8x64xf32>
    %95 = arith.mulf %86, %92 : vector<8x64xf32>
    %96 = arith.addf %94, %95 : vector<8x64xf32>
    %97 = math.tanh %96 : vector<8x64xf32>
    %98 = arith.mulf %93, %97 : vector<8x64xf32>
    %99 = arith.index_cast %75 : i32 to index
    %c0_35 = arith.constant 0 : index
    %100 = vector.load %arg11[%99, %c0_35] : memref<64x64xf32, #tpu.memory_space<vmem>>, vector<8x64xf32>
    tpu.vector_store %arg11[%99, %c0_35], %98 {strides = array<i32>} : memref<64x64xf32, #tpu.memory_space<vmem>>, vector<8x64xf32>,
    %c3_i32 = arith.constant 3 : i32
    %c8_i32_36 = arith.constant 8 : i32
    %101 = arith.muli %c3_i32, %c8_i32_36 : i32
    %102 = tpu.assume_multiple %101, 8 : i32
    %103 = arith.index_cast %102 : i32 to index
    %c0_37 = arith.constant 0 : index
    %104 = vector.load %arg10[%103, %c0_37] : memref<64x256xf32, #tpu.memory_space<vmem>>, vector<8x256xf32>
    %105 = arith.truncf %98 : vector<8x64xf32> to vector<8x64xbf16>
    %cst_38 = arith.constant dense<0.000000e+00> : vector<8x256xf32>
    %106 = tpu.matmul %105, %17, %cst_38 {dimension_numbers = #tpu.dot_dimension_numbers<[1], [0], [0], [1], [0, 0, 1, 1], [], []>} : vector<8x64xbf16>, vector<64x256xbf16>, vector<8x256xf32> -> vector<8x256xf32>
    %107 = arith.addf %104, %106 : vector<8x256xf32>
    %108 = arith.negf %107 : vector<8x256xf32>
    %109 = math.exp %108 : vector<8x256xf32>
    %cst_39 = arith.constant 1.000000e+00 : f32
    %110 = vector.broadcast %cst_39 : f32 to vector<8x256xf32>
    %111 = arith.addf %110, %109 : vector<8x256xf32>
    %112 = arith.divf %110, %111 : vector<8x256xf32>
    %113 = vector.extract_strided_slice %112 {offsets = [0, 0], sizes = [8, 64], strides = [1, 1]} : vector<8x256xf32> to vector<8x64xf32>
    %114 = vector.extract_strided_slice %112 {offsets = [0, 64], sizes = [8, 64], strides = [1, 1]} : vector<8x256xf32> to vector<8x64xf32>
    %115 = vector.extract_strided_slice %112 {offsets = [0, 128], sizes = [8, 64], strides = [1, 1]} : vector<8x256xf32> to vector<8x64xf32>
    %cst_40 = arith.constant 2.000000e+00 : f32
    %116 = vector.broadcast %cst_40 : f32 to vector<8x64xf32>
    %117 = arith.mulf %116, %115 : vector<8x64xf32>
    %cst_41 = arith.constant 1.000000e+00 : f32
    %118 = vector.broadcast %cst_41 : f32 to vector<8x64xf32>
    %119 = arith.subf %117, %118 : vector<8x64xf32>
    %120 = vector.extract_strided_slice %112 {offsets = [0, 192], sizes = [8, 64], strides = [1, 1]} : vector<8x256xf32> to vector<8x64xf32>
    %121 = arith.mulf %114, %96 : vector<8x64xf32>
    %122 = arith.mulf %113, %119 : vector<8x64xf32>
    %123 = arith.addf %121, %122 : vector<8x64xf32>
    %124 = math.tanh %123 : vector<8x64xf32>
    %125 = arith.mulf %120, %124 : vector<8x64xf32>
    %126 = arith.index_cast %102 : i32 to index
    %c0_42 = arith.constant 0 : index
    %127 = vector.load %arg11[%126, %c0_42] : memref<64x64xf32, #tpu.memory_space<vmem>>, vector<8x64xf32>
    tpu.vector_store %arg11[%126, %c0_42], %125 {strides = array<i32>} : memref<64x64xf32, #tpu.memory_space<vmem>>, vector<8x64xf32>,
    %c4_i32 = arith.constant 4 : i32
    %c8_i32_43 = arith.constant 8 : i32
    %128 = arith.muli %c4_i32, %c8_i32_43 : i32
    %129 = tpu.assume_multiple %128, 8 : i32
    %130 = arith.index_cast %129 : i32 to index
    %c0_44 = arith.constant 0 : index
    %131 = vector.load %arg10[%130, %c0_44] : memref<64x256xf32, #tpu.memory_space<vmem>>, vector<8x256xf32>
    %132 = arith.truncf %125 : vector<8x64xf32> to vector<8x64xbf16>
    %cst_45 = arith.constant dense<0.000000e+00> : vector<8x256xf32>
    %133 = tpu.matmul %132, %17, %cst_45 {dimension_numbers = #tpu.dot_dimension_numbers<[1], [0], [0], [1], [0, 0, 1, 1], [], []>} : vector<8x64xbf16>, vector<64x256xbf16>, vector<8x256xf32> -> vector<8x256xf32>
    %134 = arith.addf %131, %133 : vector<8x256xf32>
    %135 = arith.negf %134 : vector<8x256xf32>
    %136 = math.exp %135 : vector<8x256xf32>
    %cst_46 = arith.constant 1.000000e+00 : f32
    %137 = vector.broadcast %cst_46 : f32 to vector<8x256xf32>
    %138 = arith.addf %137, %136 : vector<8x256xf32>
    %139 = arith.divf %137, %138 : vector<8x256xf32>
    %140 = vector.extract_strided_slice %139 {offsets = [0, 0], sizes = [8, 64], strides = [1, 1]} : vector<8x256xf32> to vector<8x64xf32>
    %141 = vector.extract_strided_slice %139 {offsets = [0, 64], sizes = [8, 64], strides = [1, 1]} : vector<8x256xf32> to vector<8x64xf32>
    %142 = vector.extract_strided_slice %139 {offsets = [0, 128], sizes = [8, 64], strides = [1, 1]} : vector<8x256xf32> to vector<8x64xf32>
    %cst_47 = arith.constant 2.000000e+00 : f32
    %143 = vector.broadcast %cst_47 : f32 to vector<8x64xf32>
    %144 = arith.mulf %143, %142 : vector<8x64xf32>
    %cst_48 = arith.constant 1.000000e+00 : f32
    %145 = vector.broadcast %cst_48 : f32 to vector<8x64xf32>
    %146 = arith.subf %144, %145 : vector<8x64xf32>
    %147 = vector.extract_strided_slice %139 {offsets = [0, 192], sizes = [8, 64], strides = [1, 1]} : vector<8x256xf32> to vector<8x64xf32>
    %148 = arith.mulf %141, %123 : vector<8x64xf32>
    %149 = arith.mulf %140, %146 : vector<8x64xf32>
    %150 = arith.addf %148, %149 : vector<8x64xf32>
    %151 = math.tanh %150 : vector<8x64xf32>
    %152 = arith.mulf %147, %151 : vector<8x64xf32>
    %153 = arith.index_cast %129 : i32 to index
    %c0_49 = arith.constant 0 : index
    %154 = vector.load %arg11[%153, %c0_49] : memref<64x64xf32, #tpu.memory_space<vmem>>, vector<8x64xf32>
    tpu.vector_store %arg11[%153, %c0_49], %152 {strides = array<i32>} : memref<64x64xf32, #tpu.memory_space<vmem>>, vector<8x64xf32>,
    %c5_i32 = arith.constant 5 : i32
    %c8_i32_50 = arith.constant 8 : i32
    %155 = arith.muli %c5_i32, %c8_i32_50 : i32
    %156 = tpu.assume_multiple %155, 8 : i32
    %157 = arith.index_cast %156 : i32 to index
    %c0_51 = arith.constant 0 : index
    %158 = vector.load %arg10[%157, %c0_51] : memref<64x256xf32, #tpu.memory_space<vmem>>, vector<8x256xf32>
    %159 = arith.truncf %152 : vector<8x64xf32> to vector<8x64xbf16>
    %cst_52 = arith.constant dense<0.000000e+00> : vector<8x256xf32>
    %160 = tpu.matmul %159, %17, %cst_52 {dimension_numbers = #tpu.dot_dimension_numbers<[1], [0], [0], [1], [0, 0, 1, 1], [], []>} : vector<8x64xbf16>, vector<64x256xbf16>, vector<8x256xf32> -> vector<8x256xf32>
    %161 = arith.addf %158, %160 : vector<8x256xf32>
    %162 = arith.negf %161 : vector<8x256xf32>
    %163 = math.exp %162 : vector<8x256xf32>
    %cst_53 = arith.constant 1.000000e+00 : f32
    %164 = vector.broadcast %cst_53 : f32 to vector<8x256xf32>
    %165 = arith.addf %164, %163 : vector<8x256xf32>
    %166 = arith.divf %164, %165 : vector<8x256xf32>
    %167 = vector.extract_strided_slice %166 {offsets = [0, 0], sizes = [8, 64], strides = [1, 1]} : vector<8x256xf32> to vector<8x64xf32>
    %168 = vector.extract_strided_slice %166 {offsets = [0, 64], sizes = [8, 64], strides = [1, 1]} : vector<8x256xf32> to vector<8x64xf32>
    %169 = vector.extract_strided_slice %166 {offsets = [0, 128], sizes = [8, 64], strides = [1, 1]} : vector<8x256xf32> to vector<8x64xf32>
    %cst_54 = arith.constant 2.000000e+00 : f32
    %170 = vector.broadcast %cst_54 : f32 to vector<8x64xf32>
    %171 = arith.mulf %170, %169 : vector<8x64xf32>
    %cst_55 = arith.constant 1.000000e+00 : f32
    %172 = vector.broadcast %cst_55 : f32 to vector<8x64xf32>
    %173 = arith.subf %171, %172 : vector<8x64xf32>
    %174 = vector.extract_strided_slice %166 {offsets = [0, 192], sizes = [8, 64], strides = [1, 1]} : vector<8x256xf32> to vector<8x64xf32>
    %175 = arith.mulf %168, %150 : vector<8x64xf32>
    %176 = arith.mulf %167, %173 : vector<8x64xf32>
    %177 = arith.addf %175, %176 : vector<8x64xf32>
    %178 = math.tanh %177 : vector<8x64xf32>
    %179 = arith.mulf %174, %178 : vector<8x64xf32>
    %180 = arith.index_cast %156 : i32 to index
    %c0_56 = arith.constant 0 : index
    %181 = vector.load %arg11[%180, %c0_56] : memref<64x64xf32, #tpu.memory_space<vmem>>, vector<8x64xf32>
    tpu.vector_store %arg11[%180, %c0_56], %179 {strides = array<i32>} : memref<64x64xf32, #tpu.memory_space<vmem>>, vector<8x64xf32>,
    %c6_i32 = arith.constant 6 : i32
    %c8_i32_57 = arith.constant 8 : i32
    %182 = arith.muli %c6_i32, %c8_i32_57 : i32
    %183 = tpu.assume_multiple %182, 8 : i32
    %184 = arith.index_cast %183 : i32 to index
    %c0_58 = arith.constant 0 : index
    %185 = vector.load %arg10[%184, %c0_58] : memref<64x256xf32, #tpu.memory_space<vmem>>, vector<8x256xf32>
    %186 = arith.truncf %179 : vector<8x64xf32> to vector<8x64xbf16>
    %cst_59 = arith.constant dense<0.000000e+00> : vector<8x256xf32>
    %187 = tpu.matmul %186, %17, %cst_59 {dimension_numbers = #tpu.dot_dimension_numbers<[1], [0], [0], [1], [0, 0, 1, 1], [], []>} : vector<8x64xbf16>, vector<64x256xbf16>, vector<8x256xf32> -> vector<8x256xf32>
    %188 = arith.addf %185, %187 : vector<8x256xf32>
    %189 = arith.negf %188 : vector<8x256xf32>
    %190 = math.exp %189 : vector<8x256xf32>
    %cst_60 = arith.constant 1.000000e+00 : f32
    %191 = vector.broadcast %cst_60 : f32 to vector<8x256xf32>
    %192 = arith.addf %191, %190 : vector<8x256xf32>
    %193 = arith.divf %191, %192 : vector<8x256xf32>
    %194 = vector.extract_strided_slice %193 {offsets = [0, 0], sizes = [8, 64], strides = [1, 1]} : vector<8x256xf32> to vector<8x64xf32>
    %195 = vector.extract_strided_slice %193 {offsets = [0, 64], sizes = [8, 64], strides = [1, 1]} : vector<8x256xf32> to vector<8x64xf32>
    %196 = vector.extract_strided_slice %193 {offsets = [0, 128], sizes = [8, 64], strides = [1, 1]} : vector<8x256xf32> to vector<8x64xf32>
    %cst_61 = arith.constant 2.000000e+00 : f32
    %197 = vector.broadcast %cst_61 : f32 to vector<8x64xf32>
    %198 = arith.mulf %197, %196 : vector<8x64xf32>
    %cst_62 = arith.constant 1.000000e+00 : f32
    %199 = vector.broadcast %cst_62 : f32 to vector<8x64xf32>
    %200 = arith.subf %198, %199 : vector<8x64xf32>
    %201 = vector.extract_strided_slice %193 {offsets = [0, 192], sizes = [8, 64], strides = [1, 1]} : vector<8x256xf32> to vector<8x64xf32>
    %202 = arith.mulf %195, %177 : vector<8x64xf32>
    %203 = arith.mulf %194, %200 : vector<8x64xf32>
    %204 = arith.addf %202, %203 : vector<8x64xf32>
    %205 = math.tanh %204 : vector<8x64xf32>
    %206 = arith.mulf %201, %205 : vector<8x64xf32>
    %207 = arith.index_cast %183 : i32 to index
    %c0_63 = arith.constant 0 : index
    %208 = vector.load %arg11[%207, %c0_63] : memref<64x64xf32, #tpu.memory_space<vmem>>, vector<8x64xf32>
    tpu.vector_store %arg11[%207, %c0_63], %206 {strides = array<i32>} : memref<64x64xf32, #tpu.memory_space<vmem>>, vector<8x64xf32>,
    %c7_i32 = arith.constant 7 : i32
    %c8_i32_64 = arith.constant 8 : i32
    %209 = arith.muli %c7_i32, %c8_i32_64 : i32
    %210 = tpu.assume_multiple %209, 8 : i32
    %211 = arith.index_cast %210 : i32 to index
    %c0_65 = arith.constant 0 : index
    %212 = vector.load %arg10[%211, %c0_65] : memref<64x256xf32, #tpu.memory_space<vmem>>, vector<8x256xf32>
    %213 = arith.truncf %206 : vector<8x64xf32> to vector<8x64xbf16>
    %cst_66 = arith.constant dense<0.000000e+00> : vector<8x256xf32>
    %214 = tpu.matmul %213, %17, %cst_66 {dimension_numbers = #tpu.dot_dimension_numbers<[1], [0], [0], [1], [0, 0, 1, 1], [], []>} : vector<8x64xbf16>, vector<64x256xbf16>, vector<8x256xf32> -> vector<8x256xf32>
    %215 = arith.addf %212, %214 : vector<8x256xf32>
    %216 = arith.negf %215 : vector<8x256xf32>
    %217 = math.exp %216 : vector<8x256xf32>
    %cst_67 = arith.constant 1.000000e+00 : f32
    %218 = vector.broadcast %cst_67 : f32 to vector<8x256xf32>
    %219 = arith.addf %218, %217 : vector<8x256xf32>
    %220 = arith.divf %218, %219 : vector<8x256xf32>
    %221 = vector.extract_strided_slice %220 {offsets = [0, 0], sizes = [8, 64], strides = [1, 1]} : vector<8x256xf32> to vector<8x64xf32>
    %222 = vector.extract_strided_slice %220 {offsets = [0, 64], sizes = [8, 64], strides = [1, 1]} : vector<8x256xf32> to vector<8x64xf32>
    %223 = vector.extract_strided_slice %220 {offsets = [0, 128], sizes = [8, 64], strides = [1, 1]} : vector<8x256xf32> to vector<8x64xf32>
    %cst_68 = arith.constant 2.000000e+00 : f32
    %224 = vector.broadcast %cst_68 : f32 to vector<8x64xf32>
    %225 = arith.mulf %224, %223 : vector<8x64xf32>
    %cst_69 = arith.constant 1.000000e+00 : f32
    %226 = vector.broadcast %cst_69 : f32 to vector<8x64xf32>
    %227 = arith.subf %225, %226 : vector<8x64xf32>
    %228 = vector.extract_strided_slice %220 {offsets = [0, 192], sizes = [8, 64], strides = [1, 1]} : vector<8x256xf32> to vector<8x64xf32>
    %229 = arith.mulf %222, %204 : vector<8x64xf32>
    %230 = arith.mulf %221, %227 : vector<8x64xf32>
    %231 = arith.addf %229, %230 : vector<8x64xf32>
    %232 = math.tanh %231 : vector<8x64xf32>
    %233 = arith.mulf %228, %232 : vector<8x64xf32>
    %234 = arith.index_cast %210 : i32 to index
    %c0_70 = arith.constant 0 : index
    %235 = vector.load %arg11[%234, %c0_70] : memref<64x64xf32, #tpu.memory_space<vmem>>, vector<8x64xf32>
    tpu.vector_store %arg11[%234, %c0_70], %233 {strides = array<i32>} : memref<64x64xf32, #tpu.memory_space<vmem>>, vector<8x64xf32>,
    %c8_i32_71 = arith.constant 8 : i32
    %c0_72 = arith.constant 0 : index
    %c0_73 = arith.constant 0 : index
    %236 = vector.load %arg11[%c0_72, %c0_73] : memref<64x64xf32, #tpu.memory_space<vmem>>, vector<64x64xf32>
    %237 = arith.truncf %236 : vector<64x64xf32> to vector<64x64xbf16>
    %c0_74 = arith.constant 0 : index
    %c0_75 = arith.constant 0 : index
    %238 = vector.load %arg7[%c0_74, %c0_75] : memref<64x128xbf16, #tpu.memory_space<vmem>>, vector<64x128xbf16>
    %cst_76 = arith.constant dense<0.000000e+00> : vector<64x128xf32>
    %239 = tpu.matmul %237, %238, %cst_76 {dimension_numbers = #tpu.dot_dimension_numbers<[1], [0], [0], [1], [0, 0, 1, 1], [], []>} : vector<64x64xbf16>, vector<64x128xbf16>, vector<64x128xf32> -> vector<64x128xf32>
    %c0_77 = arith.constant 0 : index
    %c0_78 = arith.constant 0 : index
    %240 = vector.load %arg8[%c0_77, %c0_78] : memref<1x128xf32, #tpu.memory_space<vmem>>, vector<1x128xf32>
    %241 = vector.broadcast %240 : vector<1x128xf32> to vector<64x128xf32>
    %242 = arith.addf %239, %241 : vector<64x128xf32>
    %cst_79 = arith.constant 0.000000e+00 : f32
    %243 = vector.broadcast %cst_79 : f32 to vector<64x128xf32>
    %244 = arith.maximumf %242, %243 : vector<64x128xf32>
    %245 = vector.broadcast %cst_79 : f32 to vector<64x128xf32>
    %246 = arith.subf %242, %245 : vector<64x128xf32>
    %247 = arith.cmpf one, %246, %246 : vector<64x128xf32>
    %248 = vector.broadcast %cst_79 : f32 to vector<64x128xf32>
    %249 = arith.addf %242, %248 : vector<64x128xf32>
    %250 = math.absf %246 : vector<64x128xf32>
    %cst_80 = arith.constant 0.000000e+00 : f32
    %251 = vector.broadcast %cst_80 : f32 to vector<64x128xf32>
    %252 = arith.subf %251, %250 : vector<64x128xf32>
    %253 = math.exp %252 : vector<64x128xf32>
    %254 = math.log1p %253 : vector<64x128xf32>
    %255 = arith.addf %244, %254 : vector<64x128xf32>
    %256 = arith.select %247, %249, %255 : vector<64x128xi1>, vector<64x128xf32>
    %cst_81 = arith.constant 1.000000e-01 : f32
    %257 = vector.broadcast %cst_81 : f32 to vector<64x128xf32>
    %258 = arith.addf %256, %257 : vector<64x128xf32>
    %259 = tpu.iota {dimensions = array<i32: 1>} : vector<64x128xi32>
    %c64_i32 = arith.constant 64 : i32
    %260 = vector.broadcast %c64_i32 : i32 to vector<64x128xi32>
    %261 = arith.cmpi slt, %259, %260 : vector<64x128xi32>
    %cst_82 = arith.constant 0.000000e+00 : f32
    %262 = vector.broadcast %cst_82 : f32 to vector<64x128xf32>
    %263 = arith.select %261, %258, %262 : vector<64x128xi1>, vector<64x128xf32>
    %cst_83 = arith.constant dense<0.000000e+00> : vector<64xf32>
    %264 = vector.multi_reduction <add>, %263, %cst_83 [1] : vector<64x128xf32> to vector<64xf32>
    %265 = vector.shape_cast %264 : vector<64xf32> to vector<64x1xf32>
    %266 = vector.broadcast %265 : vector<64x1xf32> to vector<64x128xf32>
    %267 = arith.divf %258, %266 : vector<64x128xf32>
    %c0_84 = arith.constant 0 : index
    %c0_85 = arith.constant 0 : index
    %268 = vector.load %arg9[%c0_84, %c0_85] : memref<64x128xf32, #tpu.memory_space<vmem>>, vector<64x128xf32>
    tpu.vector_store %arg9[%c0_84, %c0_85], %267 {strides = array<i32>} : memref<64x128xf32, #tpu.memory_space<vmem>>, vector<64x128xf32>,
    return
  }
  func.func @transform_0(%arg0: i32) -> (i32, i32) {
    %c0_i32 = arith.constant 0 : i32
    %c0_i32_0 = arith.constant 0 : i32
    return %arg0, %c0_i32 : i32, i32
  }
  func.func @transform_1(%arg0: i32) -> (i32, i32) {
    %c0_i32 = arith.constant 0 : i32
    %c0_i32_0 = arith.constant 0 : i32
    return %arg0, %c0_i32 : i32, i32
  }
  func.func @transform_2(%arg0: i32) -> (i32, i32) {
    %c0_i32 = arith.constant 0 : i32
    %c0_i32_0 = arith.constant 0 : i32
    %c0_i32_1 = arith.constant 0 : i32
    return %c0_i32, %c0_i32_0 : i32, i32
  }
  func.func @transform_3(%arg0: i32) -> (i32, i32) {
    %c0_i32 = arith.constant 0 : i32
    %c0_i32_0 = arith.constant 0 : i32
    %c0_i32_1 = arith.constant 0 : i32
    return %c0_i32, %c0_i32_0 : i32, i32
  }
  func.func @transform_4(%arg0: i32) -> (i32, i32) {
    %c0_i32 = arith.constant 0 : i32
    %c0_i32_0 = arith.constant 0 : i32
    %c0_i32_1 = arith.constant 0 : i32
    return %c0_i32, %c0_i32_0 : i32, i32
  }
  func.func @transform_5(%arg0: i32) -> (i32, i32) {
    %c0_i32 = arith.constant 0 : i32
    %c0_i32_0 = arith.constant 0 : i32
    %c0_i32_1 = arith.constant 0 : i32
    return %c0_i32, %c0_i32_0 : i32, i32
  }
  func.func @transform_6(%arg0: i32) -> (i32, i32) {
    %c0_i32 = arith.constant 0 : i32
    %c0_i32_0 = arith.constant 0 : i32
    %c0_i32_1 = arith.constant 0 : i32
    return %c0_i32, %c0_i32_0 : i32, i32
  }
  func.func @transform_7(%arg0: i32) -> (i32, i32) {
    %c0_i32 = arith.constant 0 : i32
    %c0_i32_0 = arith.constant 0 : i32
    %c0_i32_1 = arith.constant 0 : i32
    return %c0_i32, %c0_i32_0 : i32, i32
  }
  func.func @transform_8(%arg0: i32) -> (i32, i32) {
    %c0_i32 = arith.constant 0 : i32
    %c0_i32_0 = arith.constant 0 : i32
    return %arg0, %c0_i32 : i32, i32
  }
}

</mosaic_0001>

<bundles_post_ra>
// kernel: lstm_predict_forward.1
= control target key start
LH: loop header
LB: loop body
LE: loop exit
PB: predicated region body
PF: predicated region fallthrough
CT: control target
= control target key end

     0   :  { %v1697_v0 = vmov 0   ;;  %vm125_vm0 = vcmask 1041408   ;;  %vm246_vm1 = vcmask 1045504   ;;  %vm233_vm2 = vcmask 97280   ;;  %s2182_s1 = inlined_call_operand.vmem [shape: s32[64,1], index: 1, kind: input, shape index: {}]   ;;  %s2183_s3 = inlined_call_operand.vmem [shape: bf16[4,256], index: 3, kind: input, shape index: {}]   ;;  %s2184_s2 = inlined_call_operand.vmem [shape: bf16[12,256], index: 2, kind: input, shape index: {}]   ;;  %s2185_s0 = inlined_call_operand.vmem [shape: bf16[64,12], index: 0, kind: input, shape index: {}]   ;;  %s2186_s4 = inlined_call_operand.vmem [shape: bf16[64,256], index: 4, kind: input, shape index: {}]   ;;  %s2187_s5 = inlined_call_operand.vmem [shape: f32[1,256], index: 5, kind: input, shape index: {}]   ;;  %s2188_s6 = inlined_call_operand.vmem [shape: bf16[64,128], index: 6, kind: input, shape index: {}]   ;;  %s2189_s7 = inlined_call_operand.vmem [shape: f32[1,128], index: 7, kind: input, shape index: {}]   ;;  %s2190_s8 = inlined_call_operand.vmem [shape: f32[64,128], index: 8, kind: output, shape index: {}]  }
   0x1   :  { %1545 = vset.pattern.permute.xlu1 %v1697_v0  ;;  %1544 = vset.pattern.permute.xlu0 %v1697_v0  ;;  %v34_v1 = vld [vmem:[%s2182_s1 + $0x10] sm:$0xff]  ;;  %v32_v2 = vld [vmem:[%s2182_s1] sm:$0xff]  ;;  %v35_v3 = vld [vmem:[%s2182_s1 + $0x18] sm:$0xff]  ;;  %v30_v25 = vlaneseq  ;;  %v1698_v30 = vmov 0.0   ;;  %vm112_vm5 = vcmask 31744   ;;  %vm423_vm12 = vcmask 523264  }
   0x2   :  { %47 = vperm.xlu1 %1545, %v34_v1   ;;  %41 = vperm.xlu0 %1544, %v32_v2   ;;  %v33_v4 = vld [vmem:[%s2182_s1 + $0x8] sm:$0xff]  ;;  %v1434_v5 = vld.sshfl [vmem:[%s2183_s3] sm:$0x33 pattern:$0x76325410]  ;;  %v39_v11 = vld [vmem:[%s2182_s1 + $0x38] sm:$0xff] }
   0x3   :  { %164 = vmatprep.mubr.bf16.mxu0 %v1697_v0  ;;  %305 = vmatprep.mubr.bf16.mxu1 %v1697_v0  ;;  %v111_v6 = vcombine.high %v1434_v5, %v1434_v5  ;;  %v127_v7 = vsel %vm125_vm0, %v1434_v5, 0  ;;  %v37_v8 = vld [vmem:[%s2182_s1 + $0x28] sm:$0xff]  ;;  %v36_v9 = vld [vmem:[%s2182_s1 + $0x20] sm:$0xff]  ;;  %v38_v12 = vld [vmem:[%s2182_s1 + $0x30] sm:$0xff]  ;;  %v1852_v26 = vand.u32 127, %v30_v25  ;;  %v329_v62 = vshrl.u32 %v30_v25, 7 }
   0x4   :  { %v1546_v10 = vld [vmem:[%s2184_s2 + $0x4] ss:$8 sps:$4 sm:$0x3f]   ;;  %v1548_v13 = vld [vmem:[%s2184_s2] ss:$8 sps:$4 sm:$0x3f]  }
   0x5   :  { %1435 = vmatprep.subr.msk.bf16.mxu0 %vm125_vm0, %v111_v6  ;;  %1523 = vmatprep.subr.msk.bf16.mxu1 %vm246_vm1, %v1546_v10  ;;  %v248_v14 = vsel %vm246_vm1, %v1548_v13, 0  ;;  %v1549_v15 = vld [vmem:[%s2185_s0 + $0x10] sm:$0xff]   ;;  %v1788_v16 = vld [vmem:[%s2186_s4 + $0x4] ss:$8 sps:$4 sm:$0xff]   ;;  %v1796_v17 = vld [vmem:[%s2186_s4] ss:$8 sps:$4 sm:$0xff]  }
   0x6   :  { %50 = vperm.xlu1 %1545, %v35_v3   ;;  %44 = vperm.xlu0 %1544, %v33_v4   ;;  %v1802_v18 = vld [vmem:[%s2186_s4 + $0x14] ss:$8 sps:$4 sm:$0xff]   ;;  %v1807_v19 = vld [vmem:[%s2186_s4 + $0x10] ss:$8 sps:$4 sm:$0xff]   ;;  %v1815_v21 = vld [vmem:[%s2186_s4 + $0x24] ss:$8 sps:$4 sm:$0xff]  }
   0x7   :  { %133 = vmatpush1.bf16.msra.mxu0 %v127_v7  ;;  %1524 = vmatpush1.bf16.msra.mxu1 %v248_v14  ;;  %v1556_v20 = vld [vmem:[%s2185_s0 + $0x18] sm:$0xff]   ;;  %v1824_v22 = vld [vmem:[%s2186_s4 + $0x20] ss:$8 sps:$4 sm:$0xff]   ;;  %v330_v63 = vsub.s32 0, %v329_v62  ;;  %v334_v2 = vsub.s32 1, %v329_v62 }
   0x8   :  { %1446 = vmatprep.subr.msk.bf16.mxu0 %vm246_vm1, %v1546_v10  ;;  %427 = vmatprep.subr.bf16.mxu1 %v1788_v16  ;;  %v1831_v23 = vld [vmem:[%s2186_s4 + $0x34] ss:$8 sps:$4 sm:$0xff]   ;;  %v1836_v24 = vld [vmem:[%s2186_s4 + $0x30] ss:$8 sps:$4 sm:$0xff]   ;;  %v1563_v48 = vld [vmem:[%s2185_s0] sm:$0xff]  }
   0x9   :  { %v1564_v49 = vld [vmem:[%s2185_s0 + $0x8] sm:$0xff]   ;;  %v326_v1 = vld [vmem:[%s2187_s5] sm:$0x3]  ;;  %s1699_s5 = smov 64  }
   0xa   :  { %56 = vperm.xlu1 %1545, %v37_v8   ;;  %53 = vperm.xlu0 %1544, %v36_v9   ;;  %v331_v3 = vrot.slane %v326_v1, %v330_v63  ;;  %v335_v5 = vrot.slane %v326_v1, %v334_v2 }
   0xb   :  { %1449 = vmatmul.mubr.msk.bf16.vlgmr.msra.gmra.mrb[0].mxu1 %vm233_vm2, %v1549_v15 }
   0xc   :  { %315 = vmatprep.mubr.bf16.mxu1 %v1697_v0  ;;  %428 = vmatpush1.bf16.msra.mxu1 %v1796_v17 }
   0xd   :  { %429 = vmatprep.subr.bf16.mxu1 %v1802_v18 }
   0xe   :  { %62 = vperm.xlu1 %1545, %v39_v11   ;;  %59 = vperm.xlu0 %1544, %v38_v12  }
  0x10   :  { %430 = vmatpush1.bf16.msra.mxu1 %v1807_v19 }
  0x11   :  { %431 = vmatprep.subr.bf16.mxu1 %v1815_v21 }
  0x13   :  { %1450 = vmatmul.mubr.msk.bf16.gmra.mrb[4].mxu1 %vm233_vm2, %v1556_v20 }
  0x14   :  { %459 = vmatprep.mubr.bf16.mxu1 %v1697_v0  ;;  %432 = vmatpush1.bf16.msra.mxu1 %v1824_v22 }
  0x15   :  { %433 = vmatprep.subr.bf16.mxu1 %v1831_v23 }
  0x18   :  { %434 = vmatpush1.bf16.msra.mxu1 %v1836_v24 }
  0x19   :  { %510 = vmatprep.subr.bf16.mxu1 %v1788_v16 }
  0x1b   :  { %460 = vmatmul.mubr.bf16.vlgmr.msra.gmra.mrb[8].mxu1 %v1697_v0 }
  0x1c   :  { %511 = vmatpush1.bf16.msra.mxu1 %v1796_v17  ;;  %542 = vmatprep.mubr.bf16.mxu1 %v1697_v0 }
  0x1d   :  { %512 = vmatprep.subr.bf16.mxu1 %v1802_v18 }
  0x20   :  { %513 = vmatpush1.bf16.msra.mxu1 %v1807_v19 }
  0x21   :  { %514 = vmatprep.subr.bf16.mxu1 %v1815_v21 }
  0x24   :  { %515 = vmatpush1.bf16.msra.mxu1 %v1824_v22 }
  0x25   :  { %516 = vmatprep.subr.bf16.mxu1 %v1831_v23 }
  0x28   :  { %517 = vmatpush1.bf16.msra.mxu1 %v1836_v24 }
  0x29   :  { %594 = vmatprep.subr.bf16.mxu1 %v1788_v16 }
  0x81   :  { %v42_v27 = vpop.permute.xlu0 %41  ;;  %v48_v28 = vpop.permute.xlu1 %47 }
  0x82   :  { %vm64_vm3 = vcmp.eq.s32.totalorder %v1852_v26, %v42_v27  ;;  %vm66_vm6 = vcmp.eq.s32.totalorder %v1852_v26, %v48_v28 }
  0x83   :  { %v1426_v31 = vsel %vm64_vm3, 1.0, %v1698_v30  ;;  %v1428_v35 = vsel %vm66_vm6, 1.0, %v1698_v30 }
  0x85   :  { %v45_v29 = vpop.permute.xlu0 %44  ;;  %v51_v34 = vpop.permute.xlu1 %50 }
  0x86   :  { %vm65_vm4 = vcmp.eq.s32.totalorder %v1852_v26, %v45_v29  ;;  %vm67_vm7 = vcmp.eq.s32.totalorder %v1852_v26, %v51_v34 }
  0x87   :  { %v1427_v32 = vsel %vm65_vm4, 1.0, %v1698_v30  ;;  %v1429_v36 = vsel %vm67_vm7, 1.0, %v1698_v30 }
  0x88   :  { %v88_v33 = vpack.c.bf16 %v1427_v32, %v1426_v31  ;;  %v89_v39 = vpack.c.bf16 %v1429_v36, %v1428_v35 }
  0x89   :  { %v57_v37 = vpop.permute.xlu1 %56  ;;  %v54_v38 = vpop.permute.xlu0 %53 }
  0x8a   :  { %1436 = vmatmul.mubr.msk.bf16.vlgmr.msra.gmra.mrb[0].mxu0 %vm112_vm5, %v88_v33  ;;  %vm69_vm8 = vcmp.eq.s32.totalorder %v1852_v26, %v57_v37  ;;  %vm68_vm9 = vcmp.eq.s32.totalorder %v1852_v26, %v54_v38 }
  0x8b   :  { %254 = vmatpush1.bf16.msra.mxu0 %v248_v14  ;;  %174 = vmatprep.mubr.bf16.mxu0 %v1697_v0  ;;  %v1431_v40 = vsel %vm69_vm8, 1.0, %v1698_v30  ;;  %v1430_v41 = vsel %vm68_vm9, 1.0, %v1698_v30 }
  0x8c   :  { %762 = vmatprep.subr.bf16.mxu0 %v1788_v16  ;;  %v90_v44 = vpack.c.bf16 %v1431_v40, %v1430_v41 }
  0x8d   :  { %v63_v42 = vpop.permute.xlu1 %62  ;;  %v60_v43 = vpop.permute.xlu0 %59 }
  0x8e   :  { %vm71_vm10 = vcmp.eq.s32.totalorder %v1852_v26, %v63_v42  ;;  %vm70_vm11 = vcmp.eq.s32.totalorder %v1852_v26, %v60_v43 }
  0x8f   :  { %v1433_v45 = vsel %vm71_vm10, 1.0, %v1698_v30  ;;  %v1432_v46 = vsel %vm70_vm11, 1.0, %v1698_v30 }
  0x90   :  { %v91_v47 = vpack.c.bf16 %v1433_v45, %v1432_v46 }
  0x92   :  { %1437 = vmatmul.mubr.msk.bf16.gmra.mrb[4].mxu0 %vm112_vm5, %v89_v39 }
  0x93   :  { %184 = vmatprep.mubr.bf16.mxu0 %v1697_v0 }
  0x9a   :  { %1438 = vmatmul.mubr.msk.bf16.gmra.mrb[8].mxu0 %vm112_vm5, %v90_v44 }
  0x9b   :  { %194 = vmatprep.mubr.bf16.mxu0 %v1697_v0 }
  0xa2   :  { %1439 = vmatmul.mubr.msk.bf16.gmra.mrb[12].mxu0 %vm112_vm5, %v91_v47 }
  0xa3   :  { %285 = vmatprep.mubr.bf16.mxu0 %v1697_v0 }
  0xaa   :  { %1447 = vmatmul.mubr.msk.bf16.vlgmr.msra.gmra.mrb[0].mxu0 %vm233_vm2, %v1563_v48 }
  0xab   :  { %295 = vmatprep.mubr.bf16.mxu0 %v1697_v0  ;;  %763 = vmatpush1.bf16.msra.mxu0 %v1796_v17 }
  0xac   :  { %764 = vmatprep.subr.bf16.mxu0 %v1802_v18 }
  0xaf   :  { %765 = vmatpush1.bf16.msra.mxu0 %v1807_v19 }
  0xb0   :  { %766 = vmatprep.subr.bf16.mxu0 %v1815_v21 }
  0xb2   :  { %1448 = vmatmul.mubr.msk.bf16.gmra.mrb[4].mxu0 %vm233_vm2, %v1564_v49  ;;  %vm1366_vm2 = vcmp.lt.s32.totalorder %v1852_v26, 64 }
  0xb3   :  { %767 = vmatpush1.bf16.msra.mxu0 %v1824_v22  ;;  %794 = vmatprep.mubr.bf16.mxu0 %v1697_v0 }
  0xb4   :  { %768 = vmatprep.subr.bf16.mxu0 %v1831_v23 }
  0xb7   :  { %769 = vmatpush1.bf16.msra.mxu0 %v1836_v24 }
  0xb8   :  { %930 = vmatprep.subr.bf16.mxu0 %v1788_v16 }
  0xde   :  { %v307_v50 = vpop.f32.mrb[0].mxu1 }
  0xdf   :  { %v309_v51 = vpop.f32.mrb[1].mxu1 }
  0xe0   :  { %v311_v52 = vpop.f32.mrb[2].mxu1 }
  0xe1   :  { %v313_v53 = vpop.f32.mrb[3].mxu1 }
  0xe6   :  { %v317_v54 = vpop.f32.mrb[4].mxu1 }
  0xe7   :  { %v319_v55 = vpop.f32.mrb[5].mxu1 }
  0xe8   :  { %v321_v56 = vpop.f32.mrb[6].mxu1 }
  0xe9   :  { %v323_v57 = vpop.f32.mrb[7].mxu1 }
  0xee   :  { %v461_v58 = vpop.f32.mrb[8].mxu1 }
  0xef   :  { %v463_v59 = vpop.f32.mrb[9].mxu1 }
  0xf0   :  { %v465_v60 = vpop.f32.mrb[10].mxu1 }
  0xf1   :  { %v466_v61 = vpop.f32.mrb[11].mxu1 }
 0x16d   :  { %v186_v4 = vpop.f32.mrb[8].mxu0 }
 0x16e   :  { %v308_v6 = vadd.f32 %v307_v50, %v186_v4  ;;  %v188_v7 = vpop.f32.mrb[9].mxu0 }
 0x16f   :  { %v310_v8 = vadd.f32 %v309_v51, %v188_v7  ;;  %v190_v9 = vpop.f32.mrb[10].mxu0 }
 0x170   :  { %v312_v10 = vadd.f32 %v311_v52, %v190_v9  ;;  %v192_v11 = vpop.f32.mrb[11].mxu0  ;;  %v1893_v12 = vadd.f32 %v331_v3, %v308_v6 }
 0x171   :  { %v314_v13 = vadd.f32 %v313_v53, %v192_v11  ;;  %v1895_v14 = vadd.f32 %v335_v5, %v310_v8 }
 0x172   :  { %v1897_v15 = vadd.f32 %v331_v3, %v312_v10 }
 0x173   :  { %v1899_v20 = vadd.f32 %v335_v5, %v314_v13 }
 0x175   :  { %v196_v25 = vpop.f32.mrb[12].mxu0 }
 0x176   :  { %v318_v27 = vadd.f32 %v317_v54, %v196_v25  ;;  %v198_v28 = vpop.f32.mrb[13].mxu0 }
 0x177   :  { %v320_v29 = vadd.f32 %v319_v55, %v198_v28  ;;  %v200_v30 = vpop.f32.mrb[14].mxu0 }
 0x178   :  { %v322_v31 = vadd.f32 %v321_v56, %v200_v30  ;;  %v202_v32 = vpop.f32.mrb[15].mxu0  ;;  %v1901_v33 = vadd.f32 %v331_v3, %v318_v27 }
 0x179   :  { %v324_v34 = vadd.f32 %v323_v57, %v202_v32  ;;  %v1903_v35 = vadd.f32 %v335_v5, %v320_v29 }
 0x17a   :  { %v1905_v36 = vadd.f32 %v331_v3, %v322_v31 }
 0x17b   :  { %v1907_v37 = vadd.f32 %v335_v5, %v324_v34 }
 0x17d   :  { %v287_v38 = vpop.f32.mrb[0].mxu0 }
 0x17e   :  { %v338_v39 = vadd.f32 %v331_v3, %v287_v38  ;;  %v289_v40 = vpop.f32.mrb[1].mxu0 }
 0x17f   :  { %v339_v41 = vadd.f32 %v335_v5, %v289_v40  ;;  %v291_v42 = vpop.f32.mrb[2].mxu0 }
 0x180   :  { %v468_v43 = vadd.f32 %v461_v58, %v338_v39  ;;  %v340_v44 = vadd.f32 %v331_v3, %v291_v42  ;;  %v293_v45 = vpop.f32.mrb[3].mxu0 }
 0x181   :  { %v469_v46 = vadd.f32 %v463_v59, %v339_v41  ;;  %v341_v47 = vadd.f32 %v335_v5, %v293_v45 }
 0x182   :  { %v1459_v48 = vmul.f32 -1.442695, %v468_v43 }
 0x183   :  { %v1460_v49 = vmul.f32 -1.442695, %v469_v46 }
 0x184   :  { %1569 = vpow2.f32 %v1459_v48 }
 0x185   :  { %1571 = vpow2.f32 %v1460_v49  ;;  %v297_v50 = vpop.f32.mrb[4].mxu0 }
 0x186   :  { %v1909_v51 = vadd.f32 %v331_v3, %v297_v50  ;;  %v299_v52 = vpop.f32.mrb[5].mxu0 }
 0x187   :  { %v1911_v53 = vadd.f32 %v335_v5, %v299_v52  ;;  %v301_v54 = vpop.f32.mrb[6].mxu0 }
 0x188   :  { %v1913_v55 = vadd.f32 %v331_v3, %v301_v54  ;;  %v303_v56 = vpop.f32.mrb[7].mxu0 }
 0x189   :  { %v1915_v57 = vadd.f32 %v335_v5, %v303_v56 }
 0x18e   :  { %v1570_v58 = vpop.eup %1569 }
 0x18f   :  { %v1572_v60 = vpop.eup %1571  ;;  %v476_v61 = vadd.f32 1.0, %v1570_v58 }
 0x190   :  { %v477_v59 = vadd.f32 1.0, %v1572_v60 }
 0x192   :  { %1573 = vrcp.f32 %v477_v59 }
 0x193   :  { %1575 = vrcp.f32 %v476_v61 }
 0x19c   :  { %v1574_v62 = vpop.eup %1573 }
 0x19d   :  { %v482_v63 = vmul.f32 2.0, %v1574_v62  ;;  %v1576_v2 = vpop.eup %1575 }
 0x19e   :  { %v484_v6 = vmul.f32 0.0, %v1576_v2 }
 0x19f   :  { %v1461_v1 = vadd.f32 -1.0, %v482_v63 }
 0x1a1   :  { %v485_v4 = vmul.f32 %v1576_v2, %v1461_v1 }
 0x1a3   :  { %487 = vrot.lane.b32.xlu0 %v485_v4, %s1699_s5 }
 0x215   :  { %v488_v3 = vpop.permute.xlu0 %487 }
 0x216   :  { %v490_v7 = vadd.f32 %v488_v3, %v484_v6 }
 0x218   :  { %1577 = vtanh.f32 %v490_v7 }
 0x222   :  { %v1578_v5 = vpop.eup %1577 }
 0x223   :  { %v1918_v8 = vmul.f32 %v1578_v5, %v1574_v62 }
 0x225   :  { %v503_v9 = vpack.c.bf16 %v1918_v8, %v1918_v8 }
 0x227   :  { %505 = vrot.lane.b32.xlu1 %v503_v9, %s1699_s5 }
 0x299   :  { %v506_v10 = vpop.permute.xlu1 %505 }
 0x29a   :  { %1462 = vmatmul.mubr.msk.bf16.vlgmr.msra.gmra.mrb[12].mxu1 %vm423_vm12, %v506_v10 }
 0x29b   :  { %595 = vmatpush1.bf16.msra.mxu1 %v1796_v17  ;;  %626 = vmatprep.mubr.bf16.mxu1 %v1697_v0 }
 0x29c   :  { %596 = vmatprep.subr.bf16.mxu1 %v1802_v18 }
 0x29f   :  { %597 = vmatpush1.bf16.msra.mxu1 %v1807_v19 }
 0x2a0   :  { %598 = vmatprep.subr.bf16.mxu1 %v1815_v21 }
 0x2a3   :  { %599 = vmatpush1.bf16.msra.mxu1 %v1824_v22 }
 0x2a4   :  { %600 = vmatprep.subr.bf16.mxu1 %v1831_v23 }
 0x2a7   :  { %601 = vmatpush1.bf16.msra.mxu1 %v1836_v24 }
 0x2a8   :  { %678 = vmatprep.subr.bf16.mxu1 %v1788_v16 }
 0x36d   :  { %v544_v11 = vpop.f32.mrb[12].mxu1 }
 0x36e   :  { %v551_v13 = vadd.f32 %v544_v11, %v340_v44  ;;  %v546_v25 = vpop.f32.mrb[13].mxu1 }
 0x36f   :  { %v552_v27 = vadd.f32 %v546_v25, %v341_v47  ;;  %v548_v28 = vpop.f32.mrb[14].mxu1 }
 0x370   :  { %v1463_v29 = vmul.f32 -1.442695, %v551_v13  ;;  %v549_v30 = vpop.f32.mrb[15].mxu1 }
 0x371   :  { %v1464_v31 = vmul.f32 -1.442695, %v552_v27 }
 0x372   :  { %1579 = vpow2.f32 %v1463_v29 }
 0x373   :  { %1581 = vpow2.f32 %v1464_v31 }
 0x37c   :  { %v1580_v32 = vpop.eup %1579 }
 0x37d   :  { %v1582_v34 = vpop.eup %1581  ;;  %v559_v39 = vadd.f32 1.0, %v1580_v32 }
 0x37e   :  { %v560_v38 = vadd.f32 1.0, %v1582_v34 }
 0x380   :  { %1583 = vrcp.f32 %v560_v38 }
 0x381   :  { %1585 = vrcp.f32 %v559_v39 }
 0x38a   :  { %v1584_v40 = vpop.eup %1583 }
 0x38b   :  { %v565_v41 = vmul.f32 2.0, %v1584_v40  ;;  %v1586_v43 = vpop.eup %1585 }
 0x38c   :  { %v567_v44 = vmul.f32 %v1586_v43, %v490_v7 }
 0x38d   :  { %v1465_v42 = vadd.f32 -1.0, %v565_v41 }
 0x38f   :  { %v568_v45 = vmul.f32 %v1586_v43, %v1465_v42 }
 0x391   :  { %570 = vrot.lane.b32.xlu0 %v568_v45, %s1699_s5 }
 0x403   :  { %v571_v46 = vpop.permute.xlu0 %570 }
 0x404   :  { %v573_v47 = vadd.f32 %v571_v46, %v567_v44 }
 0x406   :  { %1587 = vtanh.f32 %v573_v47 }
 0x410   :  { %v1588_v48 = vpop.eup %1587 }
 0x411   :  { %v1934_v49 = vmul.f32 %v1588_v48, %v1584_v40 }
 0x413   :  { %v587_v50 = vpack.c.bf16 %v1934_v49, %v1934_v49 }
 0x415   :  { %589 = vrot.lane.b32.xlu1 %v587_v50, %s1699_s5 }
 0x487   :  { %v590_v52 = vpop.permute.xlu1 %589 }
 0x488   :  { %1466 = vmatmul.mubr.msk.bf16.vlgmr.msra.gmra.mrb[16].mxu1 %vm423_vm12, %v590_v52 }
 0x489   :  { %679 = vmatpush1.bf16.msra.mxu1 %v1796_v17  ;;  %710 = vmatprep.mubr.bf16.mxu1 %v1697_v0 }
 0x48a   :  { %680 = vmatprep.subr.bf16.mxu1 %v1802_v18 }
 0x48d   :  { %681 = vmatpush1.bf16.msra.mxu1 %v1807_v19 }
 0x48e   :  { %682 = vmatprep.subr.bf16.mxu1 %v1815_v21 }
 0x491   :  { %683 = vmatpush1.bf16.msra.mxu1 %v1824_v22 }
 0x492   :  { %684 = vmatprep.subr.bf16.mxu1 %v1831_v23 }
 0x495   :  { %685 = vmatpush1.bf16.msra.mxu1 %v1836_v24 }
 0x496   :  { %846 = vmatprep.subr.bf16.mxu1 %v1788_v16 }
 0x55b   :  { %v628_v54 = vpop.f32.mrb[16].mxu1 }
 0x55c   :  { %v635_v56 = vadd.f32 %v628_v54, %v1909_v51  ;;  %v630_v58 = vpop.f32.mrb[17].mxu1 }
 0x55d   :  { %v636_v60 = vadd.f32 %v630_v58, %v1911_v53  ;;  %v632_v59 = vpop.f32.mrb[18].mxu1 }
 0x55e   :  { %v1467_v61 = vmul.f32 -1.442695, %v635_v56  ;;  %v633_v62 = vpop.f32.mrb[19].mxu1 }
 0x55f   :  { %v1468_v63 = vmul.f32 -1.442695, %v636_v60 }
 0x560   :  { %1589 = vpow2.f32 %v1467_v61 }
 0x561   :  { %1591 = vpow2.f32 %v1468_v63 }
 0x56a   :  { %v1590_v1 = vpop.eup %1589 }
 0x56b   :  { %v1592_v2 = vpop.eup %1591  ;;  %v643_v6 = vadd.f32 1.0, %v1590_v1 }
 0x56c   :  { %v644_v4 = vadd.f32 1.0, %v1592_v2 }
 0x56e   :  { %1593 = vrcp.f32 %v644_v4 }
 0x56f   :  { %1595 = vrcp.f32 %v643_v6 }
 0x578   :  { %v1594_v3 = vpop.eup %1593 }
 0x579   :  { %v649_v7 = vmul.f32 2.0, %v1594_v3  ;;  %v1596_v9 = vpop.eup %1595 }
 0x57a   :  { %v651_v53 = vmul.f32 %v1596_v9, %v573_v47 }
 0x57b   :  { %v1469_v5 = vadd.f32 -1.0, %v649_v7 }
 0x57d   :  { %v652_v51 = vmul.f32 %v1596_v9, %v1469_v5 }
 0x57f   :  { %654 = vrot.lane.b32.xlu0 %v652_v51, %s1699_s5 }
 0x5f1   :  { %v655_v10 = vpop.permute.xlu0 %654 }
 0x5f2   :  { %v657_v11 = vadd.f32 %v655_v10, %v651_v53 }
 0x5f4   :  { %1597 = vtanh.f32 %v657_v11 }
 0x5fe   :  { %v1598_v13 = vpop.eup %1597 }
 0x5ff   :  { %v1952_v25 = vmul.f32 %v1598_v13, %v1594_v3 }
 0x601   :  { %v671_v27 = vpack.c.bf16 %v1952_v25, %v1952_v25 }
 0x603   :  { %673 = vrot.lane.b32.xlu1 %v671_v27, %s1699_s5 }
 0x675   :  { %v674_v28 = vpop.permute.xlu1 %673 }
 0x676   :  { %1470 = vmatmul.mubr.msk.bf16.vlgmr.msra.gmra.mrb[20].mxu1 %vm423_vm12, %v674_v28 }
 0x677   :  { %847 = vmatpush1.bf16.msra.mxu1 %v1796_v17  ;;  %878 = vmatprep.mubr.bf16.mxu1 %v1697_v0 }
 0x678   :  { %848 = vmatprep.subr.bf16.mxu1 %v1802_v18 }
 0x67b   :  { %849 = vmatpush1.bf16.msra.mxu1 %v1807_v19 }
 0x67c   :  { %850 = vmatprep.subr.bf16.mxu1 %v1815_v21 }
 0x67f   :  { %851 = vmatpush1.bf16.msra.mxu1 %v1824_v22 }
 0x680   :  { %852 = vmatprep.subr.bf16.mxu1 %v1831_v23 }
 0x683   :  { %853 = vmatpush1.bf16.msra.mxu1 %v1836_v24 }
 0x684   :  { %1014 = vmatprep.subr.bf16.mxu1 %v1788_v16 }
 0x749   :  { %v712_v29 = vpop.f32.mrb[20].mxu1 }
 0x74a   :  { %v719_v30 = vadd.f32 %v712_v29, %v1913_v55  ;;  %v714_v31 = vpop.f32.mrb[21].mxu1 }
 0x74b   :  { %v720_v32 = vadd.f32 %v714_v31, %v1915_v57  ;;  %v716_v34 = vpop.f32.mrb[22].mxu1 }
 0x74c   :  { %v1471_v38 = vmul.f32 -1.442695, %v719_v30  ;;  %v717_v39 = vpop.f32.mrb[23].mxu1 }
 0x74d   :  { %v1472_v40 = vmul.f32 -1.442695, %v720_v32 }
 0x74e   :  { %1599 = vpow2.f32 %v1471_v38 }
 0x74f   :  { %1601 = vpow2.f32 %v1472_v40 }
 0x758   :  { %v1600_v41 = vpop.eup %1599 }
 0x759   :  { %v1602_v42 = vpop.eup %1601  ;;  %v727_v45 = vadd.f32 1.0, %v1600_v41 }
 0x75a   :  { %v728_v43 = vadd.f32 1.0, %v1602_v42 }
 0x75c   :  { %1603 = vrcp.f32 %v728_v43 }
 0x75d   :  { %1605 = vrcp.f32 %v727_v45 }
 0x766   :  { %v1604_v44 = vpop.eup %1603 }
 0x767   :  { %v733_v16 = vmul.f32 2.0, %v1604_v44  ;;  %v1606_v47 = vpop.eup %1605 }
 0x768   :  { %v735_v57 = vmul.f32 %v1606_v47, %v657_v11 }
 0x769   :  { %v1473_v46 = vadd.f32 -1.0, %v733_v16 }
 0x76b   :  { %v736_v55 = vmul.f32 %v1606_v47, %v1473_v46 }
 0x76d   :  { %738 = vrot.lane.b32.xlu0 %v736_v55, %s1699_s5 }
 0x7df   :  { %v739_v48 = vpop.permute.xlu0 %738 }
 0x7e0   :  { %v741_v50 = vadd.f32 %v739_v48, %v735_v57 }
 0x7e2   :  { %1607 = vtanh.f32 %v741_v50 }
 0x7ec   :  { %v1608_v52 = vpop.eup %1607 }
 0x7ed   :  { %v1970_v54 = vmul.f32 %v1608_v52, %v1604_v44 }
 0x7ef   :  { %v755_v56 = vpack.c.bf16 %v1970_v54, %v1970_v54 }
 0x7f1   :  { %757 = vrot.lane.b32.xlu1 %v755_v56, %s1699_s5 }
 0x863   :  { %v758_v58 = vpop.permute.xlu1 %757 }
 0x864   :  { %1474 = vmatmul.mubr.msk.bf16.vlgmr.msra.gmra.mrb[16].mxu0 %vm423_vm12, %v758_v58 }
 0x865   :  { %931 = vmatpush1.bf16.msra.mxu0 %v1796_v17  ;;  %962 = vmatprep.mubr.bf16.mxu0 %v1697_v0 }
 0x866   :  { %932 = vmatprep.subr.bf16.mxu0 %v1802_v18 }
 0x869   :  { %933 = vmatpush1.bf16.msra.mxu0 %v1807_v19 }
 0x86a   :  { %934 = vmatprep.subr.bf16.mxu0 %v1815_v21 }
 0x86d   :  { %935 = vmatpush1.bf16.msra.mxu0 %v1824_v22 }
 0x86e   :  { %936 = vmatprep.subr.bf16.mxu0 %v1831_v23 }
 0x871   :  { %937 = vmatpush1.bf16.msra.mxu0 %v1836_v24 }
 0x937   :  { %v796_v60 = vpop.f32.mrb[16].mxu0 }
 0x938   :  { %v803_v59 = vadd.f32 %v796_v60, %v1893_v12  ;;  %v798_v61 = vpop.f32.mrb[17].mxu0 }
 0x939   :  { %v804_v62 = vadd.f32 %v798_v61, %v1895_v14  ;;  %v800_v63 = vpop.f32.mrb[18].mxu0 }
 0x93a   :  { %v1475_v1 = vmul.f32 -1.442695, %v803_v59  ;;  %v801_v2 = vpop.f32.mrb[19].mxu0 }
 0x93b   :  { %v1476_v4 = vmul.f32 -1.442695, %v804_v62 }
 0x93c   :  { %1609 = vpow2.f32 %v1475_v1 }
 0x93d   :  { %1611 = vpow2.f32 %v1476_v4 }
 0x946   :  { %v1610_v6 = vpop.eup %1609 }
 0x947   :  { %v1612_v3 = vpop.eup %1611  ;;  %v811_v5 = vadd.f32 1.0, %v1610_v6 }
 0x948   :  { %v812_v7 = vadd.f32 1.0, %v1612_v3 }
 0x94a   :  { %1613 = vrcp.f32 %v812_v7 }
 0x94b   :  { %1615 = vrcp.f32 %v811_v5 }
 0x954   :  { %v1614_v9 = vpop.eup %1613 }
 0x955   :  { %v817_v51 = vmul.f32 2.0, %v1614_v9  ;;  %v1616_v10 = vpop.eup %1615 }
 0x956   :  { %v819_v14 = vmul.f32 %v1616_v10, %v741_v50 }
 0x957   :  { %v1477_v53 = vadd.f32 -1.0, %v817_v51 }
 0x959   :  { %v820_v12 = vmul.f32 %v1616_v10, %v1477_v53 }
 0x95b   :  { %822 = vrot.lane.b32.xlu0 %v820_v12, %s1699_s5 }
 0x9cd   :  { %v823_v11 = vpop.permute.xlu0 %822 }
 0x9ce   :  { %v825_v13 = vadd.f32 %v823_v11, %v819_v14 }
 0x9d0   :  { %1617 = vtanh.f32 %v825_v13 }
 0x9da   :  { %v1618_v27 = vpop.eup %1617 }
 0x9db   :  { %v1987_v28 = vmul.f32 %v1618_v27, %v1614_v9 }
 0x9dd   :  { %v839_v29 = vpack.c.bf16 %v1987_v28, %v1987_v28 }
 0x9df   :  { %841 = vrot.lane.b32.xlu1 %v839_v29, %s1699_s5 }
 0xa51   :  { %v842_v30 = vpop.permute.xlu1 %841 }
 0xa52   :  { %1478 = vmatmul.mubr.msk.bf16.vlgmr.msra.gmra.mrb[24].mxu1 %vm423_vm12, %v842_v30 }
 0xa53   :  { %1015 = vmatpush1.bf16.msra.mxu1 %v1796_v17  ;;  %1046 = vmatprep.mubr.bf16.mxu1 %v1697_v0 }
 0xa54   :  { %1016 = vmatprep.subr.bf16.mxu1 %v1802_v18 }
 0xa57   :  { %1017 = vmatpush1.bf16.msra.mxu1 %v1807_v19 }
 0xa58   :  { %1018 = vmatprep.subr.bf16.mxu1 %v1815_v21 }
 0xa5b   :  { %1019 = vmatpush1.bf16.msra.mxu1 %v1824_v22 }
 0xa5c   :  { %1020 = vmatprep.subr.bf16.mxu1 %v1831_v23 }
 0xa5f   :  { %1021 = vmatpush1.bf16.msra.mxu1 %v1836_v24 }
 0xb25   :  { %v880_v31 = vpop.f32.mrb[24].mxu1 }
 0xb26   :  { %v887_v32 = vadd.f32 %v880_v31, %v1897_v15  ;;  %v882_v34 = vpop.f32.mrb[25].mxu1 }
 0xb27   :  { %v888_v17 = vadd.f32 %v882_v34, %v1899_v20  ;;  %v884_v38 = vpop.f32.mrb[26].mxu1 }
 0xb28   :  { %v1479_v0 = vmul.f32 -1.442695, %v887_v32  ;;  %v885_v39 = vpop.f32.mrb[27].mxu1 }
 0xb29   :  { %v1480_v18 = vmul.f32 -1.442695, %v888_v17 }
 0xb2a   :  { %1619 = vpow2.f32 %v1479_v0  ;;  %v1565_v0 = vld [vmem:[%s2188_s6] sm:$0xff]  }
 0xb2b   :  { %1621 = vpow2.f32 %v1480_v18  ;;  %1507 = vmatprep.subr.bf16.mxu0 %v1565_v0  ;;  %v1567_v18 = vld [vmem:[%s2188_s6 + $0x10] sm:$0xff]  }
 0xb34   :  { %v1620_v19 = vpop.eup %1619 }
 0xb35   :  { %v1622_v21 = vpop.eup %1621  ;;  %v895_v22 = vadd.f32 1.0, %v1620_v19 }
 0xb36   :  { %v896_v40 = vadd.f32 1.0, %v1622_v21 }
 0xb38   :  { %1623 = vrcp.f32 %v896_v40 }
 0xb39   :  { %1625 = vrcp.f32 %v895_v22  ;;  %v1568_v22 = vld [vmem:[%s2188_s6 + $0x18] sm:$0xff]  }
 0xb42   :  { %v1624_v23 = vpop.eup %1623 }
 0xb43   :  { %v901_v24 = vmul.f32 2.0, %v1624_v23  ;;  %v1626_v42 = vpop.eup %1625 }
 0xb44   :  { %v903_v20 = vmul.f32 %v1626_v42, %v825_v13 }
 0xb45   :  { %v1481_v41 = vadd.f32 -1.0, %v901_v24 }
 0xb47   :  { %v904_v15 = vmul.f32 %v1626_v42, %v1481_v41 }
 0xb49   :  { %906 = vrot.lane.b32.xlu0 %v904_v15, %s1699_s5 }
 0xbbb   :  { %v907_v43 = vpop.permute.xlu0 %906 }
 0xbbc   :  { %v909_v45 = vadd.f32 %v907_v43, %v903_v20 }
 0xbbe   :  { %1627 = vtanh.f32 %v909_v45 }
 0xbc8   :  { %v1628_v44 = vpop.eup %1627 }
 0xbc9   :  { %v2004_v16 = vmul.f32 %v1628_v44, %v1624_v23 }
 0xbcb   :  { %v923_v46 = vpack.c.bf16 %v2004_v16, %v2004_v16 }
 0xbcd   :  { %925 = vrot.lane.b32.xlu1 %v923_v46, %s1699_s5 }
 0xc3f   :  { %v926_v47 = vpop.permute.xlu1 %925 }
 0xc40   :  { %1482 = vmatmul.mubr.msk.bf16.vlgmr.msra.gmra.mrb[20].mxu0 %vm423_vm12, %v926_v47 }
 0xc41   :  { %1508 = vmatpush3.bf16.msra.mxu0 %v1565_v0 }
 0xd13   :  { %v964_v55 = vpop.f32.mrb[20].mxu0 }
 0xd14   :  { %v971_v57 = vadd.f32 %v964_v55, %v1901_v33  ;;  %v966_v48 = vpop.f32.mrb[21].mxu0 }
 0xd15   :  { %v972_v50 = vadd.f32 %v966_v48, %v1903_v35  ;;  %v968_v52 = vpop.f32.mrb[22].mxu0 }
 0xd16   :  { %v1483_v56 = vmul.f32 -1.442695, %v971_v57  ;;  %v969_v58 = vpop.f32.mrb[23].mxu0 }
 0xd17   :  { %v1484_v60 = vmul.f32 -1.442695, %v972_v50 }
 0xd18   :  { %1629 = vpow2.f32 %v1483_v56 }
 0xd19   :  { %1631 = vpow2.f32 %v1484_v60  ;;  %v2059_v60 = vld [vmem:[%s2189_s7] ss:$0 sm:$0xff] }
 0xd22   :  { %v1630_v59 = vpop.eup %1629 }
 0xd23   :  { %v1632_v61 = vpop.eup %1631  ;;  %v979_v63 = vadd.f32 1.0, %v1630_v59 }
 0xd24   :  { %v980_v62 = vadd.f32 1.0, %v1632_v61 }
 0xd26   :  { %1633 = vrcp.f32 %v980_v62 }
 0xd27   :  { %1635 = vrcp.f32 %v979_v63 }
 0xd30   :  { %v1634_v1 = vpop.eup %1633 }
 0xd31   :  { %v985_v2 = vmul.f32 2.0, %v1634_v1  ;;  %v1636_v6 = vpop.eup %1635 }
 0xd32   :  { %v987_v35 = vmul.f32 %v1636_v6, %v909_v45 }
 0xd33   :  { %v1485_v4 = vadd.f32 -1.0, %v985_v2 }
 0xd35   :  { %v988_v33 = vmul.f32 %v1636_v6, %v1485_v4 }
 0xd37   :  { %990 = vrot.lane.b32.xlu0 %v988_v33, %s1699_s5 }
 0xda9   :  { %v991_v3 = vpop.permute.xlu0 %990 }
 0xdaa   :  { %v993_v7 = vadd.f32 %v991_v3, %v987_v35 }
 0xdac   :  { %1637 = vtanh.f32 %v993_v7 }
 0xdb6   :  { %v1638_v5 = vpop.eup %1637 }
 0xdb7   :  { %v995_v9 = vmul.f32 %v1638_v5, %v1634_v1 }
 0xdb9   :  { %v1007_v51 = vpack.c.bf16 %v995_v9, %v995_v9 }
 0xdbb   :  { %1009 = vrot.lane.b32.xlu1 %v1007_v51, %s1699_s5 }
 0xdbf   :  { %494 = vrot.lane.b32.xlu1 %v1918_v8, %s1699_s5 }
 0xdc3   :  { %661 = vrot.lane.b32.xlu1 %v1952_v25, %s1699_s5 }
 0xdc7   :  { %829 = vrot.lane.b32.xlu1 %v1987_v28, %s1699_s5 }
 0xdcb   :  { %997 = vrot.lane.b32.xlu1 %v995_v9, %s1699_s5 }
 0xe2d   :  { %v1010_v53 = vpop.permute.xlu1 %1009 }
 0xe2e   :  { %1486 = vmatmul.mubr.msk.bf16.vlgmr.msra.gmra.mrb[28].mxu1 %vm423_vm12, %v1010_v53 }
 0xe31   :  { %v495_v10 = vpop.permute.xlu1 %494 }
 0xe32   :  { %497 = vst.msk [vmem:[#allocation3] sm:$0xff] %vm423_vm12, %v495_v10 }
 0xe35   :  { %v662_v12 = vpop.permute.xlu1 %661 }
 0xe36   :  { %665 = vst.msk [vmem:[#allocation3 + $0x10] sm:$0xff] %vm423_vm12, %v662_v12 }
 0xe39   :  { %v830_v14 = vpop.permute.xlu1 %829  ;;  %v1086_v43 = vld [vmem:[#allocation3] sm:$0xff] }
 0xe3a   :  { %833 = vst.msk [vmem:[#allocation3 + $0x20] sm:$0xff] %vm423_vm12, %v830_v14 }
 0xe3d   :  { %v998_v8 = vpop.permute.xlu1 %997 }
 0xe3e   :  { %1001 = vst.msk [vmem:[#allocation3 + $0x30] sm:$0xff] %vm423_vm12, %v998_v8 }
 0xe41   :  { %v1090_v55 = vld [vmem:[#allocation3 + $0x20] sm:$0xff] }
 0xe45   :  { %v1092_v52 = vld [vmem:[#allocation3 + $0x30] sm:$0xff] }
 0xf01   :  { %v1048_v25 = vpop.f32.mrb[28].mxu1 }
 0xf02   :  { %v1055_v11 = vadd.f32 %v1048_v25, %v1905_v36  ;;  %v1050_v13 = vpop.f32.mrb[29].mxu1  ;;  %v1566_v36 = vld [vmem:[%s2188_s6 + $0x8] sm:$0xff]  }
 0xf03   :  { %v1056_v27 = vadd.f32 %v1050_v13, %v1907_v37  ;;  %v1052_v28 = vpop.f32.mrb[30].mxu1  ;;  %1509 = vmatprep.subr.bf16.mxu0 %v1566_v36 }
 0xf04   :  { %v1487_v29 = vmul.f32 -1.442695, %v1055_v11  ;;  %v1053_v30 = vpop.f32.mrb[31].mxu1  ;;  %1510 = vmatpush3.bf16.msra.mxu0 %v1566_v36 }
 0xf05   :  { %v1488_v31 = vmul.f32 -1.442695, %v1056_v27  ;;  %1511 = vmatprep.subr.bf16.mxu0 %v1567_v18 }
 0xf06   :  { %1639 = vpow2.f32 %v1487_v29 }
 0xf07   :  { %1641 = vpow2.f32 %v1488_v31 }
 0xf08   :  { %1512 = vmatpush3.bf16.msra.mxu0 %v1567_v18 }
 0xf09   :  { %1513 = vmatprep.subr.bf16.mxu0 %v1568_v22 }
 0xf0c   :  { %1514 = vmatpush3.bf16.msra.mxu0 %v1568_v22 }
 0xf10   :  { %v1640_v32 = vpop.eup %1639 }
 0xf11   :  { %v1642_v34 = vpop.eup %1641  ;;  %v1063_v38 = vadd.f32 1.0, %v1640_v32 }
 0xf12   :  { %v1064_v17 = vadd.f32 1.0, %v1642_v34 }
 0xf14   :  { %1643 = vrcp.f32 %v1064_v17 }
 0xf15   :  { %1645 = vrcp.f32 %v1063_v38 }
 0xf1e   :  { %v1644_v37 = vpop.eup %1643 }
 0xf1f   :  { %v1069_v39 = vmul.f32 2.0, %v1644_v37  ;;  %v1646_v21 = vpop.eup %1645 }
 0xf20   :  { %v1071_v23 = vmul.f32 %v1646_v21, %v993_v7 }
 0xf21   :  { %v1489_v19 = vadd.f32 -1.0, %v1069_v39 }
 0xf23   :  { %v1072_v40 = vmul.f32 %v1646_v21, %v1489_v19 }
 0xf25   :  { %1074 = vrot.lane.b32.xlu0 %v1072_v40, %s1699_s5 }
 0xf29   :  { %577 = vrot.lane.b32.xlu0 %v1934_v49, %s1699_s5 }
 0xf2d   :  { %745 = vrot.lane.b32.xlu0 %v1970_v54, %s1699_s5 }
 0xf31   :  { %913 = vrot.lane.b32.xlu0 %v2004_v16, %s1699_s5  ;;  %v1088_v16 = vld [vmem:[#allocation3 + $0x10] sm:$0xff] }
 0xf97   :  { %v1075_v24 = vpop.permute.xlu0 %1074 }
 0xf98   :  { %v1077_v41 = vadd.f32 %v1075_v24, %v1071_v23 }
 0xf9a   :  { %1647 = vtanh.f32 %v1077_v41 }
 0xf9b   :  { %v578_v42 = vpop.permute.xlu0 %577 }
 0xf9c   :  { %581 = vst.msk [vmem:[#allocation3 + $0x8] sm:$0xff] %vm423_vm12, %v578_v42 }
 0xf9f   :  { %v746_v15 = vpop.permute.xlu0 %745 }
 0xfa0   :  { %749 = vst.msk [vmem:[#allocation3 + $0x18] sm:$0xff] %vm423_vm12, %v746_v15 }
 0xfa3   :  { %v914_v20 = vpop.permute.xlu0 %913  ;;  %v1087_v45 = vld [vmem:[#allocation3 + $0x8] sm:$0xff] }
 0xfa4   :  { %v1648_v49 = vpop.eup %1647  ;;  %917 = vst.msk [vmem:[#allocation3 + $0x28] sm:$0xff] %vm423_vm12, %v914_v20  ;;  %v1094_v54 = vpack.c.bf16 %v1087_v45, %v1086_v43 }
 0xfa5   :  { %v1079_v44 = vmul.f32 %v1648_v49, %v1644_v37 }
 0xfa6   :  { %1515 = vmatprep.mubr.msk.bf16.mxu0 %vm423_vm12, %v1094_v54 }
 0xfa7   :  { %1081 = vrot.lane.b32.xlu0 %v1079_v44, %s1699_s5  ;;  %v1089_v46 = vld [vmem:[#allocation3 + $0x18] sm:$0xff] }
 0xfa8   :  { %v1095_v47 = vpack.c.bf16 %v1089_v46, %v1088_v16 }
 0xfaa   :  { %1516 = vmatmul.mubr.msk.bf16.vlgmr.msra.gmra.mrb[24].mxu0 %vm423_vm12, %v1095_v47 }
 0xfab   :  { %v1091_v57 = vld [vmem:[#allocation3 + $0x28] sm:$0xff] }
 0xfac   :  { %v1096_v48 = vpack.c.bf16 %v1091_v57, %v1090_v55 }
 0xfae   :  { %1519 = vmatprep.mubr.msk.bf16.mxu0 %vm423_vm12, %v1096_v48 }
0x1019   :  { %v1082_v50 = vpop.permute.xlu0 %1081 }
0x101a   :  { %1085 = vst.msk [vmem:[#allocation3 + $0x38] sm:$0xff] %vm423_vm12, %v1082_v50 }
0x1021   :  { %v1093_v56 = vld [vmem:[#allocation3 + $0x38] sm:$0xff] }
0x1022   :  { %v1097_v58 = vpack.c.bf16 %v1093_v56, %v1092_v52 }
0x1024   :  { %1520 = vmatmul.mubr.msk.bf16.gmra.mrb[28].mxu0 %vm423_vm12, %v1097_v58 }
0x107d   :  { %v1517_v59 = vpop.f32.mrb[24].mxu0 }
0x107e   :  { %v2062_v61 = vadd.f32 %v1517_v59, %v2059_v60  ;;  %v1183_v62 = vpop.f32.mrb[25].mxu0 }
0x107f   :  { %v2065_v63 = vadd.f32 %v2059_v60, %v1183_v62  ;;  %v1518_v1 = vpop.f32.mrb[26].mxu0 }
0x1080   :  { %v1240_v2 = vand.u32 2147483647, %v2062_v61  ;;  %v2069_v4 = vadd.f32 %v1518_v1, %v2059_v60  ;;  %v1186_v6 = vpop.f32.mrb[27].mxu0  ;;  %v1216_v21 = vmax.f32 %v2062_v61, 0.0  ;;  %vm1224_vm5 = vcmp.ne.f32.partialorder %v2062_v61, %v2062_v61 }
0x1081   :  { %v1238_v33 = vand.u32 2147483647, %v2065_v63  ;;  %v2073_v35 = vadd.f32 %v2059_v60, %v1186_v6  ;;  %v1214_v40 = vmax.f32 %v2065_v63, 0.0  ;;  %vm1222_vm1 = vcmp.ne.f32.partialorder %v2065_v63, %v2065_v63 }
0x1082   :  { %v1248_v3 = vsub.f32 0.0, %v1240_v2  ;;  %v1241_v7 = vand.u32 2147483647, %v2069_v4  ;;  %v1217_v41 = vmax.f32 %v2069_v4, 0.0  ;;  %vm1225_vm3 = vcmp.ne.f32.partialorder %v2069_v4, %v2069_v4 }
0x1083   :  { %v1246_v5 = vsub.f32 0.0, %v1238_v33  ;;  %v1239_v9 = vand.u32 2147483647, %v2073_v35  ;;  %v1215_v45 = vmax.f32 %v2073_v35, 0.0  ;;  %vm1223_vm4 = vcmp.ne.f32.partialorder %v2073_v35, %v2073_v35 }
0x1084   :  { %v1258_v51 = vmul.f32 1.442695, %v1248_v3  ;;  %v1249_v53 = vsub.f32 0.0, %v1241_v7 }
0x1085   :  { %v1254_v10 = vmul.f32 1.442695, %v1246_v5  ;;  %v1247_v12 = vsub.f32 0.0, %v1239_v9 }
0x1086   :  { %1649 = vpow2.f32 %v1258_v51  ;;  %v1260_v14 = vmul.f32 1.442695, %v1249_v53 }
0x1087   :  { %1651 = vpow2.f32 %v1254_v10  ;;  %v1256_v8 = vmul.f32 1.442695, %v1247_v12 }
0x1088   :  { %1653 = vpow2.f32 %v1260_v14 }
0x1089   :  { %1655 = vpow2.f32 %v1256_v8 }
0x1090   :  { %v1650_v25 = vpop.eup %1649 }
0x1091   :  { %v1652_v11 = vpop.eup %1651  ;;  %v1288_v13 = vadd.f32 1.0, %v1650_v25  ;;  %v1291_v32 = vmul.f32 -0.5, %v1650_v25  ;;  %v1294_v37 = vand.u32 2147483647, %v1650_v25 }
0x1092   :  { %v1654_v27 = vpop.eup %1653  ;;  %v1270_v28 = vadd.f32 1.0, %v1652_v11  ;;  %v1273_v34 = vmul.f32 -0.5, %v1652_v11  ;;  %v1276_v39 = vand.u32 2147483647, %v1652_v11 }
0x1093   :  { %v1656_v29 = vpop.eup %1655  ;;  %v1297_v30 = vadd.f32 1.0, %v1654_v27  ;;  %1657 = vlog2.f32 %v1288_v13  ;;  %v1300_v17 = vmul.f32 -0.5, %v1654_v27  ;;  %v1292_v0 = vadd.f32 1.0, %v1291_v32 }
0x1094   :  { %1659 = vlog2.f32 %v1270_v28  ;;  %v1279_v31 = vadd.f32 1.0, %v1656_v29  ;;  %v1282_v38 = vmul.f32 -0.5, %v1656_v29  ;;  %v1274_v36 = vadd.f32 1.0, %v1273_v34 }
0x1095   :  { %1661 = vlog2.f32 %v1297_v30  ;;  %v1301_v18 = vadd.f32 1.0, %v1300_v17  ;;  %v1303_v23 = vand.u32 2147483647, %v1654_v27  ;;  %v1285_v42 = vand.u32 2147483647, %v1656_v29 }
0x1096   :  { %1663 = vlog2.f32 %v1279_v31  ;;  %v1283_v22 = vadd.f32 1.0, %v1282_v38  ;;  %v1293_v20 = vmul.f32 %v1650_v25, %v1292_v0  ;;  %v1275_v54 = vmul.f32 %v1652_v11, %v1274_v36 }
0x1097   :  { %vm1295_vm13 = vcmp.lt.f32.partialorder %v1294_v37, 0.0004427343  ;;  %vm1277_vm14 = vcmp.lt.f32.partialorder %v1276_v39, 0.0004427343  ;;  %v1302_v46 = vmul.f32 %v1654_v27, %v1301_v18  ;;  %vm1304_vm15 = vcmp.lt.f32.partialorder %v1303_v23, 0.0004427343 }
0x1098   :  { %v1284_v48 = vmul.f32 %v1656_v29, %v1283_v22  ;;  %vm1286_vm0 = vcmp.lt.f32.partialorder %v1285_v42, 0.0004427343 }
0x109d   :  { %v1658_v19 = vpop.eup %1657 }
0x109e   :  { %v1660_v24 = vpop.eup %1659  ;;  %v1290_v15 = vmul.f32 0.6931472, %v1658_v19 }
0x109f   :  { %v1662_v43 = vpop.eup %1661  ;;  %v1272_v49 = vmul.f32 0.6931472, %v1660_v24 }
0x10a0   :  { %v1664_v44 = vpop.eup %1663  ;;  %v1299_v16 = vmul.f32 0.6931472, %v1662_v43  ;;  %v1296_v47 = vsel %vm1295_vm13, %v1293_v20, %v1290_v15 }
0x10a1   :  { %v1278_v55 = vsel %vm1277_vm14, %v1275_v54, %v1272_v49  ;;  %v1281_v57 = vmul.f32 0.6931472, %v1664_v44  ;;  %v1344_v56 = vadd.f32 %v1296_v47, %v1216_v21 }
0x10a2   :  { %v1342_v50 = vadd.f32 %v1278_v55, %v1214_v40  ;;  %v1305_v52 = vsel %vm1304_vm15, %v1302_v46, %v1299_v16 }
0x10a3   :  { %v1287_v58 = vsel %vm1286_vm0, %v1284_v48, %v1281_v57  ;;  %v1345_v59 = vadd.f32 %v1305_v52, %v1217_v41 }
0x10a4   :  { %v1350_v62 = vsel %vm1222_vm1, %v2065_v63, %v1342_v50  ;;  %v1343_v1 = vadd.f32 %v1287_v58, %v1215_v45  ;;  %v1352_v63 = vsel %vm1224_vm5, %v2062_v61, %v1344_v56 }
0x10a5   :  { %v2087_v2 = vadd.f32 0.1, %v1350_v62  ;;  %v1353_v6 = vsel %vm1225_vm3, %v2069_v4, %v1345_v59  ;;  %v2106_v9 = vadd.f32 0.1, %v1352_v63 }
0x10a6   :  { %v1351_v33 = vsel %vm1223_vm4, %v2073_v35, %v1343_v1  ;;  %v2101_v5 = vadd.f32 0.1, %v1353_v6 }
0x10a7   :  { %v1367_v3 = vsel %vm1366_vm2, %v2087_v2, 0.0  ;;  %v2099_v7 = vadd.f32 0.1, %v1351_v33  ;;  %v1369_v35 = vsel %vm1366_vm2, %v2106_v9, 0.0 }
0x10a8   :  { %1375 = vadd.xlane.f32.xlu1 %v1367_v3  ;;  %v1370_v61 = vsel %vm1366_vm2, %v2101_v5, 0.0 }
0x10a9   :  { %v1368_v4 = vsel %vm1366_vm2, %v2099_v7, 0.0 }
0x10aa   :  { %1377 = vadd.xlane.f32.xlu0 %v1368_v4 }
0x10ac   :  { %1381 = vadd.xlane.f32.xlu1 %v1370_v61 }
0x10ae   :  { %1379 = vadd.xlane.f32.xlu0 %v1369_v35 }
0x10f7   :  { %v1521_v51 = vpop.f32.mrb[28].mxu0 }
0x10f8   :  { %v2115_v53 = vadd.f32 %v1521_v51, %v2059_v60  ;;  %v1199_v10 = vpop.f32.mrb[29].mxu0 }
0x10f9   :  { %v2118_v12 = vadd.f32 %v2059_v60, %v1199_v10  ;;  %v1522_v14 = vpop.f32.mrb[30].mxu0 }
0x10fa   :  { %v1244_v8 = vand.u32 2147483647, %v2115_v53  ;;  %v2122_v25 = vadd.f32 %v1522_v14, %v2059_v60  ;;  %v1202_v11 = vpop.f32.mrb[31].mxu0  ;;  %v1220_v16 = vmax.f32 %v2115_v53, 0.0  ;;  %vm1228_vm11 = vcmp.ne.f32.partialorder %v2115_v53, %v2115_v53 }
0x10fb   :  { %v1242_v13 = vand.u32 2147483647, %v2118_v12  ;;  %v2126_v27 = vadd.f32 %v2059_v60, %v1202_v11  ;;  %v1218_v46 = vmax.f32 %v2118_v12, 0.0  ;;  %vm1226_vm10 = vcmp.ne.f32.partialorder %v2118_v12, %v2118_v12 }
0x10fc   :  { %v1252_v28 = vsub.f32 0.0, %v1244_v8  ;;  %v1245_v29 = vand.u32 2147483647, %v2122_v25  ;;  %v1221_v57 = vmax.f32 %v2122_v25, 0.0  ;;  %vm1229_vm13 = vcmp.ne.f32.partialorder %v2122_v25, %v2122_v25 }
0x10fd   :  { %v1250_v30 = vsub.f32 0.0, %v1242_v13  ;;  %v1243_v31 = vand.u32 2147483647, %v2126_v27  ;;  %v1219_v35 = vmax.f32 %v2126_v27, 0.0  ;;  %vm1227_vm12 = vcmp.ne.f32.partialorder %v2126_v27, %v2126_v27 }
0x10fe   :  { %v1266_v32 = vmul.f32 1.442695, %v1252_v28  ;;  %v1253_v34 = vsub.f32 0.0, %v1245_v29 }
0x10ff   :  { %v1262_v17 = vmul.f32 1.442695, %v1250_v30  ;;  %v1251_v38 = vsub.f32 0.0, %v1243_v31 }
0x1100   :  { %1665 = vpow2.f32 %v1266_v32  ;;  %v1268_v0 = vmul.f32 1.442695, %v1253_v34 }
0x1101   :  { %1667 = vpow2.f32 %v1262_v17  ;;  %v1264_v36 = vmul.f32 1.442695, %v1251_v38 }
0x1102   :  { %1669 = vpow2.f32 %v1268_v0 }
0x1103   :  { %1671 = vpow2.f32 %v1264_v36 }
0x110a   :  { %v1666_v37 = vpop.eup %1665 }
0x110b   :  { %v1668_v39 = vpop.eup %1667  ;;  %v1324_v60 = vadd.f32 1.0, %v1666_v37  ;;  %v1327_v23 = vmul.f32 -0.5, %v1666_v37  ;;  %v1330_v45 = vand.u32 2147483647, %v1666_v37 }
0x110c   :  { %v1670_v18 = vpop.eup %1669  ;;  %v1306_v19 = vadd.f32 1.0, %v1668_v39  ;;  %v1309_v24 = vmul.f32 -0.5, %v1668_v39  ;;  %v1312_v43 = vand.u32 2147483647, %v1668_v39 }
0x110d   :  { %v1672_v21 = vpop.eup %1671  ;;  %1673 = vlog2.f32 %v1324_v60  ;;  %v1333_v40 = vadd.f32 1.0, %v1670_v18  ;;  %v1336_v41 = vmul.f32 -0.5, %v1670_v18  ;;  %v1328_v15 = vadd.f32 1.0, %v1327_v23 }
0x110e   :  { %1675 = vlog2.f32 %v1306_v19  ;;  %v1315_v22 = vadd.f32 1.0, %v1672_v21  ;;  %v1318_v42 = vmul.f32 -0.5, %v1672_v21  ;;  %v1310_v20 = vadd.f32 1.0, %v1309_v24 }
0x110f   :  { %1677 = vlog2.f32 %v1333_v40  ;;  %v1337_v49 = vadd.f32 1.0, %v1336_v41  ;;  %v1339_v54 = vand.u32 2147483647, %v1670_v18  ;;  %v1321_v48 = vand.u32 2147483647, %v1672_v21 }
0x1110   :  { %1679 = vlog2.f32 %v1315_v22  ;;  %v1319_v47 = vadd.f32 1.0, %v1318_v42  ;;  %v1329_v52 = vmul.f32 %v1666_v37, %v1328_v15  ;;  %v1311_v59 = vmul.f32 %v1668_v39, %v1310_v20 }
0x1111   :  { %vm1313_vm6 = vcmp.lt.f32.partialorder %v1312_v43, 0.0004427343  ;;  %vm1331_vm7 = vcmp.lt.f32.partialorder %v1330_v45, 0.0004427343  ;;  %v1338_v33 = vmul.f32 %v1670_v18, %v1337_v49  ;;  %vm1340_vm8 = vcmp.lt.f32.partialorder %v1339_v54, 0.0004427343 }
0x1112   :  { %v1320_v4 = vmul.f32 %v1672_v21, %v1319_v47  ;;  %vm1322_vm9 = vcmp.lt.f32.partialorder %v1321_v48, 0.0004427343 }
0x1117   :  { %v1674_v44 = vpop.eup %1673 }
0x1118   :  { %v1676_v55 = vpop.eup %1675  ;;  %v1326_v50 = vmul.f32 0.6931472, %v1674_v44 }
0x1119   :  { %v1678_v56 = vpop.eup %1677  ;;  %v1308_v58 = vmul.f32 0.6931472, %v1676_v55 }
0x111a   :  { %v1680_v62 = vpop.eup %1679  ;;  %v1332_v1 = vsel %vm1331_vm7, %v1329_v52, %v1326_v50  ;;  %v1335_v6 = vmul.f32 0.6931472, %v1678_v56 }
0x111b   :  { %v1314_v63 = vsel %vm1313_vm6, %v1311_v59, %v1308_v58  ;;  %v1317_v3 = vmul.f32 0.6931472, %v1680_v62  ;;  %v1348_v61 = vadd.f32 %v1332_v1, %v1220_v16 }
0x111c   :  { %v1346_v51 = vadd.f32 %v1314_v63, %v1218_v46  ;;  %v1341_v10 = vsel %vm1340_vm8, %v1338_v33, %v1335_v6 }
0x111d   :  { %v1323_v14 = vsel %vm1322_vm9, %v1320_v4, %v1317_v3  ;;  %v1349_v8 = vadd.f32 %v1341_v10, %v1221_v57  ;;  %v1356_v28 = vsel %vm1228_vm11, %v2115_v53, %v1348_v61 }
0x111e   :  { %v1354_v11 = vsel %vm1226_vm10, %v2118_v12, %v1346_v51  ;;  %v1347_v13 = vadd.f32 %v1323_v14, %v1219_v35  ;;  %v1364_v17 = vadd.f32 0.1, %v1356_v28 }
0x111f   :  { %v1362_v29 = vadd.f32 0.1, %v1354_v11  ;;  %v1357_v31 = vsel %vm1229_vm13, %v2122_v25, %v1349_v8 }
0x1120   :  { %v1355_v30 = vsel %vm1227_vm12, %v2126_v27, %v1347_v13  ;;  %v1365_v12 = vadd.f32 0.1, %v1357_v31  ;;  %v1373_v38 = vsel %vm1366_vm2, %v1364_v17, 0.0 }
0x1121   :  { %v1371_v32 = vsel %vm1366_vm2, %v1362_v29, 0.0  ;;  %v1363_v34 = vadd.f32 0.1, %v1355_v30 }
0x1122   :  { %1383 = vadd.xlane.f32.xlu0 %v1371_v32  ;;  %v1374_v27 = vsel %vm1366_vm2, %v1365_v12, 0.0 }
0x1123   :  { %v1372_v53 = vsel %vm1366_vm2, %v1363_v34, 0.0 }
0x1124   :  { %1385 = vadd.xlane.f32.xlu1 %v1372_v53 }
0x1126   :  { %1387 = vadd.xlane.f32.xlu0 %v1373_v38 }
0x1128   :  { %1389 = vadd.xlane.f32.xlu1 %v1374_v27 }
0x1135   :  { %v1376_v25 = vpop.xlane.xlu1 %1375 }
0x1136   :  { %1681 = vrcp.f32 %v1376_v25 }
0x1137   :  { %v1378_v0 = vpop.xlane.xlu0 %1377 }
0x1138   :  { %1683 = vrcp.f32 %v1378_v0 }
0x1139   :  { %v1382_v36 = vpop.xlane.xlu1 %1381 }
0x113a   :  { %1685 = vrcp.f32 %v1382_v36 }
0x113b   :  { %v1380_v37 = vpop.xlane.xlu0 %1379 }
0x113c   :  { %1687 = vrcp.f32 %v1380_v37 }
0x1140   :  { %v1682_v39 = vpop.eup %1681 }
0x1141   :  { %v1392_v60 = vmul.f32 %v1682_v39, %v2087_v2 }
0x1142   :  { %v1684_v18 = vpop.eup %1683 }
0x1143   :  { %1407 = vst [vmem:[%s2190_s8] sm:$0xff] %v1392_v60  ;;  %v1394_v26 = vmul.f32 %v1684_v18, %v2099_v7 }
0x1144   :  { %v1686_v19 = vpop.eup %1685 }
0x1145   :  { %1408 = vst [vmem:[%s2190_s8 + $0x8] sm:$0xff] %v1394_v26  ;;  %v1398_v21 = vmul.f32 %v1686_v19, %v2101_v5 }
0x1146   :  { %v1688_v40 = vpop.eup %1687 }
0x1147   :  { %1410 = vst [vmem:[%s2190_s8 + $0x18] sm:$0xff] %v1398_v21  ;;  %v1396_v2 = vmul.f32 %v1688_v40, %v2106_v9 }
0x1149   :  { %1409 = vst [vmem:[%s2190_s8 + $0x10] sm:$0xff] %v1396_v2 }
0x11af   :  { %v1384_v22 = vpop.xlane.xlu0 %1383 }
0x11b0   :  { %1689 = vrcp.f32 %v1384_v22 }
0x11b1   :  { %v1386_v7 = vpop.xlane.xlu1 %1385 }
0x11b2   :  { %1691 = vrcp.f32 %v1386_v7 }
0x11b3   :  { %v1388_v23 = vpop.xlane.xlu0 %1387 }
0x11b4   :  { %1693 = vrcp.f32 %v1388_v23 }
0x11b5   :  { %v1390_v24 = vpop.xlane.xlu1 %1389 }
0x11b6   :  { %1695 = vrcp.f32 %v1390_v24 }
0x11ba   :  { %v1690_v5 = vpop.eup %1689 }
0x11bb   :  { %v1400_v41 = vmul.f32 %v1690_v5, %v1362_v29 }
0x11bc   :  { %v1692_v42 = vpop.eup %1691 }
0x11bd   :  { %1411 = vst [vmem:[%s2190_s8 + $0x20] sm:$0xff] %v1400_v41  ;;  %v1402_v9 = vmul.f32 %v1692_v42, %v1363_v34 }
0x11be   :  { %v1694_v15 = vpop.eup %1693 }
0x11bf   :  { %1412 = vst [vmem:[%s2190_s8 + $0x28] sm:$0xff] %v1402_v9  ;;  %v1404_v20 = vmul.f32 %v1694_v15, %v1364_v17 }
0x11c0   :  { %v1696_v43 = vpop.eup %1695 }
0x11c1   :  { %1413 = vst [vmem:[%s2190_s8 + $0x30] sm:$0xff] %v1404_v20  ;;  %v1406_v45 = vmul.f32 %v1696_v43, %v1365_v12 }
0x11c3   :  { %1414 = vst [vmem:[%s2190_s8 + $0x38] sm:$0xff] %v1406_v45 }

</bundles_post_ra>
